<compile_context>
chip_gen: v6e
topology: v6e:2x2x1
jax: 0.10.0
libtpu: 0.0.40
codegen_flags: <defaults>
</compile_context>

<pallas_src>
import jax
import jax.numpy as jnp
from jax import lax
from jax.experimental import pallas as pl
from jax.experimental.pallas import tpu as pltpu


def _round_up(x, m):
    return ((x + m - 1) // m) * m


# ----------------------------------------------------------------------------- kernel
def lstm_head_kernel(x_ref, w_ih_ref, b_ref, w_hh_ref, w_out_ref, b_out_ref,
                     logits_ref, gx_scr):
    """Whole-sequence LSTM recurrence + classifier head in one kernel invocation.

    x_ref      : (T*Bp, Ep)   bf16   time-major embedded input, flattened over (T, Bp)
    w_ih_ref   : (Ep, 4*Hp)   bf16   W_ih^T, gate blocks lane-padded
    b_ref      : (1, 4*Hp)    f32    fused bias (b_ih + b_hh), lane-padded per gate
    w_hh_ref   : (Hp, 4*Hp)   bf16   W_hh^T, gate blocks lane-padded
    w_out_ref  : (Hp, Cp)     bf16   classifier weight (zero-padded)
    b_out_ref  : (1, Cp)      f32
    logits_ref : (Bp, Cp)     f32    output
    gx_scr     : (T*Bp, 4*Hp) f32    precomputed input projection (+ bias)
    """
    Bp = logits_ref.shape[0]
    Hp = w_hh_ref.shape[0]
    T = x_ref.shape[0] // Bp

    # ---- (1) Non-recurrent input projection, hoisted out of the recurrence --------
    # One MXU matmul over all timesteps (good row utilization); bias folded in here so
    # the loop body re-broadcasts nothing.  bf16 operands, f32 accumulation.
    gx_scr[...] = (
        jnp.dot(x_ref[...], w_ih_ref[...], preferred_element_type=jnp.float32)
        + b_ref[...]
    )

    # ---- (2) Serial recurrence: h, c live in vregs (fori_loop carry) ---------------
    w_hh = w_hh_ref[...]                                   # loop-invariant, bf16

    def step(t, carry):
        h, c = carry                                       # (Bp, Hp) f32 each
        row = pl.multiple_of(t * Bp, Bp)
        gates = gx_scr[pl.ds(row, Bp), :] + jnp.dot(
            h.astype(jnp.bfloat16), w_hh, preferred_element_type=jnp.float32)
        # Whole-vreg 128-lane gate slabs (PyTorch order i, f, g, o); all math f32.
        i_g = jax.nn.sigmoid(gates[:, 0 * Hp:1 * Hp])
        f_g = jax.nn.sigmoid(gates[:, 1 * Hp:2 * Hp])
        g_g = jnp.tanh(gates[:, 2 * Hp:3 * Hp])
        o_g = jax.nn.sigmoid(gates[:, 3 * Hp:4 * Hp])
        c_new = f_g * c + i_g * g_g
        h_new = o_g * jnp.tanh(c_new)
        return (h_new, c_new)

    # Padded lanes stay exactly 0: padded gate pre-activations are 0 =>
    # c_pad' = 0.5*c_pad, h_pad' = 0.5*tanh(0) = 0, with c_pad0 = 0.
    h0 = jnp.zeros((Bp, Hp), jnp.float32)
    c0 = jnp.zeros((Bp, Hp), jnp.float32)
    h_last, _ = lax.fori_loop(0, T, step, (h0, c0), unroll=min(T, 8))

    # ---- (3) Classifier head on last hidden state, lane-dense store ----------------
    logits_ref[...] = (
        jnp.dot(h_last.astype(jnp.bfloat16), w_out_ref[...],
                preferred_element_type=jnp.float32)
        + b_out_ref[...]
    )


# ----------------------------------------------------------------------------- wrapper
def pack_params_for_kernel(params):
    """Fuse + zero-pad PyTorch-layout params into the kernel's MXU-friendly layout."""
    emb = params["embed"]                    # (V, E) f32
    w_ih = params["w_ih"]                    # (4H, E)
    w_hh = params["w_hh"]                    # (4H, H)
    b = params["b_ih"] + params["b_hh"]      # (4H,)
    w_out = params["w_out"]                  # (C, H)
    b_out = params["b_out"]                  # (C,)

    V, E = emb.shape
    H = w_hh.shape[1]
    C = w_out.shape[0]
    Ep = _round_up(E, 128)
    Hp = _round_up(H, 128)
    Cp = _round_up(C, 128)

    def pad_gate_cols(w_t):                  # (rows, 4H) -> (rows, 4*Hp)
        rows = w_t.shape[0]
        out = jnp.zeros((rows, 4 * Hp), jnp.float32)
        for g in range(4):
            out = out.at[:, g * Hp:g * Hp + H].set(w_t[:, g * H:(g + 1) * H])
        return out

    w_ih_p = jnp.zeros((Ep, 4 * Hp), jnp.float32).at[:E].set(pad_gate_cols(w_ih.T))
    w_hh_p = jnp.zeros((Hp, 4 * Hp), jnp.float32).at[:H].set(pad_gate_cols(w_hh.T))
    b_p = pad_gate_cols(b[None, :])                                   # (1, 4Hp) f32

    w_out_p = jnp.zeros((Hp, Cp), jnp.float32).at[:H, :C].set(w_out.T)
    b_out_p = jnp.zeros((1, Cp), jnp.float32).at[0, :C].set(b_out)

    # Pre-pad the embedding table columns once (E -> Ep) so the runtime gather already
    # yields a lane-aligned slab and no jnp.pad of x is needed per call.
    emb_p = jnp.zeros((V, Ep), jnp.float32).at[:, :E].set(emb)

    return {
        "embed": emb_p.astype(jnp.bfloat16),      # MXU / DMA operands in bf16
        "w_ih": w_ih_p.astype(jnp.bfloat16),
        "w_hh": w_hh_p.astype(jnp.bfloat16),
        "b": b_p,                                  # biases stay f32 (added post-dot)
        "w_out_t": w_out_p.astype(jnp.bfloat16),
        "b_out": b_out_p,
        "E": E, "H": H, "C": C, "Ep": Ep, "Hp": Hp, "Cp": Cp,
    }


def rnn_classifier_forward(tokens, kp):
    """tokens: (T, B) int32 (time-major).  Returns logits (B, nclasses) f32."""
    T, B = tokens.shape
    C = kp["C"]
    Ep, Hp, Cp = kp["Ep"], kp["Hp"], kp["Cp"]
    Bp = _round_up(B, 8)

    # Only the tiny int32 token matrix is padded (Bp rows); embedding table is
    # pre-padded to Ep columns, so jnp.take directly yields (T, Bp, Ep) bf16 aligned.
    tokens_p = jnp.pad(tokens, ((0, 0), (0, Bp - B)))
    x = jnp.take(kp["embed"], tokens_p, axis=0)            # (T, Bp, Ep) bf16
    x2d = x.reshape(T * Bp, Ep)                            # contiguous, free reshape

    grid_spec = pltpu.PrefetchScalarGridSpec(
        num_scalar_prefetch=0,
        grid=(1,),                                          # whole recurrence in one body
        in_specs=[
            pl.BlockSpec((T * Bp, Ep), lambda i: (0, 0)),   # x (flattened over T,Bp)
            pl.BlockSpec((Ep, 4 * Hp), lambda i: (0, 0)),   # W_ih^T
            pl.BlockSpec((1, 4 * Hp), lambda i: (0, 0)),    # fused bias
            pl.BlockSpec((Hp, 4 * Hp), lambda i: (0, 0)),   # W_hh^T
            pl.BlockSpec((Hp, Cp), lambda i: (0, 0)),       # W_out^T
            pl.BlockSpec((1, Cp), lambda i: (0, 0)),        # b_out
        ],
        out_specs=pl.BlockSpec((Bp, Cp), lambda i: (0, 0)),
        scratch_shapes=[
            pltpu.VMEM((T * Bp, 4 * Hp), jnp.float32),      # precomputed gates_x
        ],
    )

    logits_padded = pl.pallas_call(
        lstm_head_kernel,
        out_shape=jax.ShapeDtypeStruct((Bp, Cp), jnp.float32),
        grid_spec=grid_spec,
        compiler_params=pltpu.CompilerParams(
            dimension_semantics=("arbitrary",),
            # Explicit scoped-VMEM budget; safe on v5e/v6e/v7x at these shapes.
            # Re-derive x tiling / streaming for v7x (64 MiB physical) at large T*B.
            vmem_limit_bytes=32 * 1024 * 1024,
        ),
    )(x2d, kp["w_ih"], kp["b"], kp["w_hh"], kp["w_out_t"], kp["b_out"])

    return logits_padded[:B, :C]


# ----------------------------------------------------------------------------- reference
def rnn_classifier_reference(tokens, params):
    """Plain-JAX f32 reference of the same forward pass (PyTorch-layout params)."""
    x = jnp.take(params["embed"], tokens, axis=0)          # (T, B, E)
    w_ih_t = params["w_ih"].T                              # (E, 4H)
    w_hh_t = params["w_hh"].T                              # (H, 4H)
    b = (params["b_ih"] + params["b_hh"])[None, :]         # (1, 4H)
    H = params["w_hh"].shape[1]
    B = tokens.shape[1]

    def step(carry, x_t):
        h, c = carry
        gates = x_t @ w_ih_t + h @ w_hh_t + b
        i = jax.nn.sigmoid(gates[:, 0 * H:1 * H])
        f = jax.nn.sigmoid(gates[:, 1 * H:2 * H])
        g = jnp.tanh(gates[:, 2 * H:3 * H])
        o = jax.nn.sigmoid(gates[:, 3 * H:4 * H])
        c = f * c + i * g
        h = o * jnp.tanh(c)
        return (h, c), None

    h0 = jnp.zeros((B, H), jnp.float32)
    (h, _), _ = jax.lax.scan(step, (h0, h0), x)
    return h @ params["w_out"].T + params["b_out"][None, :]


def init_params(key, vocab_size, emb_dim, hidden_size, nclasses):
    """PyTorch-layout parameters (same shapes/gate order as nn.LSTM / nn.Linear)."""
    ks = jax.random.split(key, 7)
    scale = 0.1
    return {
        "embed": jax.random.normal(ks[0], (vocab_size, emb_dim), jnp.float32) * scale,
        "w_ih": jax.random.normal(ks[1], (4 * hidden_size, emb_dim), jnp.float32) * scale,
        "w_hh": jax.random.normal(ks[2], (4 * hidden_size, hidden_size), jnp.float32) * scale,
        "b_ih": jax.random.normal(ks[3], (4 * hidden_size,), jnp.float32) * scale,
        "b_hh": jax.random.normal(ks[4], (4 * hidden_size,), jnp.float32) * scale,
        "w_out": jax.random.normal(ks[5], (nclasses, hidden_size), jnp.float32) * scale,
        "b_out": jax.random.normal(ks[6], (nclasses,), jnp.float32) * scale,
    }


if __name__ == "__main__":
    # Small shapes consistent with the module's forward:
    #   vocab=100, emb_dim=32, hidden=32, depth=1, nclasses=5, seq=8, batch=4.
    V, E, H, C = 100, 32, 32, 5
    T, B = 8, 4

    key = jax.random.PRNGKey(0)
    k_tok, k_par = jax.random.split(key)
    params = init_params(k_par, V, E, H, C)
    tokens = jax.random.randint(k_tok, (T, B), 0, V, dtype=jnp.int32)

    kernel_params = pack_params_for_kernel(params)
    logits = rnn_classifier_forward(tokens, kernel_params)
    logits = jax.block_until_ready(logits)

    ref = rnn_classifier_reference(tokens, params)
    assert logits.shape == (B, C)
    # bf16 MXU operands (f32 accumulation / gate math) => not bit-identical to the
    # f32 reference; tolerance loosened accordingly.
    assert jnp.allclose(logits, ref, atol=2e-2, rtol=2e-2), "mismatch vs reference"

    print("KERNEL_OK")
</pallas_src>

<mosaic_0001>
module attributes {stable_mosaic.version = 11 : i64} {
  func.func @lstm_head_kernel(%arg0: i32, %arg1: memref<64x128xbf16, #tpu.memory_space<vmem>>, %arg2: memref<128x512xbf16, #tpu.memory_space<vmem>>, %arg3: memref<1x512xf32, #tpu.memory_space<vmem>>, %arg4: memref<128x512xbf16, #tpu.memory_space<vmem>>, %arg5: memref<128x128xbf16, #tpu.memory_space<vmem>>, %arg6: memref<1x128xf32, #tpu.memory_space<vmem>>, %arg7: memref<8x128xf32, #tpu.memory_space<vmem>>, %arg8: memref<64x512xf32, #tpu.memory_space<vmem>>) attributes {dimension_semantics = [#tpu.dimension_semantics<arbitrary>], iteration_bounds = array<i64: 1>, scalar_prefetch = 0 : i64, scratch_operands = 1 : i64, tpu.core_type = #tpu.core_type<tc>, window_params = [{pipeline_mode = #tpu.pipeline_mode<synchronous>, transform_indices = @transform_0, window_bounds = array<i64: 64, 128>}, {pipeline_mode = #tpu.pipeline_mode<synchronous>, transform_indices = @transform_1, window_bounds = array<i64: 128, 512>}, {pipeline_mode = #tpu.pipeline_mode<synchronous>, transform_indices = @transform_2, window_bounds = array<i64: 1, 512>}, {pipeline_mode = #tpu.pipeline_mode<synchronous>, transform_indices = @transform_3, window_bounds = array<i64: 128, 512>}, {pipeline_mode = #tpu.pipeline_mode<synchronous>, transform_indices = @transform_4, window_bounds = array<i64: 128, 128>}, {pipeline_mode = #tpu.pipeline_mode<synchronous>, transform_indices = @transform_5, window_bounds = array<i64: 1, 128>}, {pipeline_mode = #tpu.pipeline_mode<synchronous>, transform_indices = @transform_6, window_bounds = array<i64: 8, 128>}]} {
    %c0 = arith.constant 0 : index
    %c0_0 = arith.constant 0 : index
    %0 = vector.load %arg1[%c0, %c0_0] : memref<64x128xbf16, #tpu.memory_space<vmem>>, vector<64x128xbf16>
    %c0_1 = arith.constant 0 : index
    %c0_2 = arith.constant 0 : index
    %1 = vector.load %arg2[%c0_1, %c0_2] : memref<128x512xbf16, #tpu.memory_space<vmem>>, vector<128x512xbf16>
    %cst = arith.constant dense<0.000000e+00> : vector<64x512xf32>
    %2 = tpu.matmul %0, %1, %cst {dimension_numbers = #tpu.dot_dimension_numbers<[1], [0], [0], [1], [0, 0, 1, 1], [], []>} : vector<64x128xbf16>, vector<128x512xbf16>, vector<64x512xf32> -> vector<64x512xf32>
    %c0_3 = arith.constant 0 : index
    %c0_4 = arith.constant 0 : index
    %3 = vector.load %arg3[%c0_3, %c0_4] : memref<1x512xf32, #tpu.memory_space<vmem>>, vector<1x512xf32>
    %4 = vector.broadcast %3 : vector<1x512xf32> to vector<64x512xf32>
    %5 = arith.addf %2, %4 : vector<64x512xf32>
    %c0_5 = arith.constant 0 : index
    %c0_6 = arith.constant 0 : index
    %6 = vector.load %arg8[%c0_5, %c0_6] : memref<64x512xf32, #tpu.memory_space<vmem>>, vector<64x512xf32>
    tpu.vector_store %arg8[%c0_5, %c0_6], %5 {strides = array<i32>} : memref<64x512xf32, #tpu.memory_space<vmem>>, vector<64x512xf32>,
    %c0_7 = arith.constant 0 : index
    %c0_8 = arith.constant 0 : index
    %7 = vector.load %arg4[%c0_7, %c0_8] : memref<128x512xbf16, #tpu.memory_space<vmem>>, vector<128x512xbf16>
    %cst_9 = arith.constant 0.000000e+00 : f32
    %8 = vector.broadcast %cst_9 : f32 to vector<8x128xf32>
    %cst_10 = arith.constant 0.000000e+00 : f32
    %9 = vector.broadcast %cst_10 : f32 to vector<8x128xf32>
    %c0_i32 = arith.constant 0 : i32
    %c8_i32 = arith.constant 8 : i32
    %10 = arith.muli %c0_i32, %c8_i32 : i32
    %11 = tpu.assume_multiple %10, 8 : i32
    %12 = arith.index_cast %11 : i32 to index
    %c0_11 = arith.constant 0 : index
    %13 = vector.load %arg8[%12, %c0_11] : memref<64x512xf32, #tpu.memory_space<vmem>>, vector<8x512xf32>
    %14 = arith.truncf %8 : vector<8x128xf32> to vector<8x128xbf16>
    %cst_12 = arith.constant dense<0.000000e+00> : vector<8x512xf32>
    %15 = tpu.matmul %14, %7, %cst_12 {dimension_numbers = #tpu.dot_dimension_numbers<[1], [0], [0], [1], [0, 0, 1, 1], [], []>} : vector<8x128xbf16>, vector<128x512xbf16>, vector<8x512xf32> -> vector<8x512xf32>
    %16 = arith.addf %13, %15 : vector<8x512xf32>
    %17 = vector.extract_strided_slice %16 {offsets = [0, 0], sizes = [8, 128], strides = [1, 1]} : vector<8x512xf32> to vector<8x128xf32>
    %18 = arith.negf %17 : vector<8x128xf32>
    %19 = math.exp %18 : vector<8x128xf32>
    %cst_13 = arith.constant 1.000000e+00 : f32
    %20 = vector.broadcast %cst_13 : f32 to vector<8x128xf32>
    %21 = arith.addf %20, %19 : vector<8x128xf32>
    %22 = arith.divf %20, %21 : vector<8x128xf32>
    %23 = vector.extract_strided_slice %16 {offsets = [0, 128], sizes = [8, 128], strides = [1, 1]} : vector<8x512xf32> to vector<8x128xf32>
    %24 = arith.negf %23 : vector<8x128xf32>
    %25 = math.exp %24 : vector<8x128xf32>
    %cst_14 = arith.constant 1.000000e+00 : f32
    %26 = vector.broadcast %cst_14 : f32 to vector<8x128xf32>
    %27 = arith.addf %26, %25 : vector<8x128xf32>
    %28 = arith.divf %26, %27 : vector<8x128xf32>
    %29 = vector.extract_strided_slice %16 {offsets = [0, 256], sizes = [8, 128], strides = [1, 1]} : vector<8x512xf32> to vector<8x128xf32>
    %30 = math.tanh %29 : vector<8x128xf32>
    %31 = vector.extract_strided_slice %16 {offsets = [0, 384], sizes = [8, 128], strides = [1, 1]} : vector<8x512xf32> to vector<8x128xf32>
    %32 = arith.negf %31 : vector<8x128xf32>
    %33 = math.exp %32 : vector<8x128xf32>
    %cst_15 = arith.constant 1.000000e+00 : f32
    %34 = vector.broadcast %cst_15 : f32 to vector<8x128xf32>
    %35 = arith.addf %34, %33 : vector<8x128xf32>
    %36 = arith.divf %34, %35 : vector<8x128xf32>
    %37 = arith.mulf %28, %9 : vector<8x128xf32>
    %38 = arith.mulf %22, %30 : vector<8x128xf32>
    %39 = arith.addf %37, %38 : vector<8x128xf32>
    %40 = math.tanh %39 : vector<8x128xf32>
    %41 = arith.mulf %36, %40 : vector<8x128xf32>
    %c1_i32 = arith.constant 1 : i32
    %c8_i32_16 = arith.constant 8 : i32
    %42 = arith.muli %c1_i32, %c8_i32_16 : i32
    %43 = tpu.assume_multiple %42, 8 : i32
    %44 = arith.index_cast %43 : i32 to index
    %c0_17 = arith.constant 0 : index
    %45 = vector.load %arg8[%44, %c0_17] : memref<64x512xf32, #tpu.memory_space<vmem>>, vector<8x512xf32>
    %46 = arith.truncf %41 : vector<8x128xf32> to vector<8x128xbf16>
    %cst_18 = arith.constant dense<0.000000e+00> : vector<8x512xf32>
    %47 = tpu.matmul %46, %7, %cst_18 {dimension_numbers = #tpu.dot_dimension_numbers<[1], [0], [0], [1], [0, 0, 1, 1], [], []>} : vector<8x128xbf16>, vector<128x512xbf16>, vector<8x512xf32> -> vector<8x512xf32>
    %48 = arith.addf %45, %47 : vector<8x512xf32>
    %49 = vector.extract_strided_slice %48 {offsets = [0, 0], sizes = [8, 128], strides = [1, 1]} : vector<8x512xf32> to vector<8x128xf32>
    %50 = arith.negf %49 : vector<8x128xf32>
    %51 = math.exp %50 : vector<8x128xf32>
    %cst_19 = arith.constant 1.000000e+00 : f32
    %52 = vector.broadcast %cst_19 : f32 to vector<8x128xf32>
    %53 = arith.addf %52, %51 : vector<8x128xf32>
    %54 = arith.divf %52, %53 : vector<8x128xf32>
    %55 = vector.extract_strided_slice %48 {offsets = [0, 128], sizes = [8, 128], strides = [1, 1]} : vector<8x512xf32> to vector<8x128xf32>
    %56 = arith.negf %55 : vector<8x128xf32>
    %57 = math.exp %56 : vector<8x128xf32>
    %cst_20 = arith.constant 1.000000e+00 : f32
    %58 = vector.broadcast %cst_20 : f32 to vector<8x128xf32>
    %59 = arith.addf %58, %57 : vector<8x128xf32>
    %60 = arith.divf %58, %59 : vector<8x128xf32>
    %61 = vector.extract_strided_slice %48 {offsets = [0, 256], sizes = [8, 128], strides = [1, 1]} : vector<8x512xf32> to vector<8x128xf32>
    %62 = math.tanh %61 : vector<8x128xf32>
    %63 = vector.extract_strided_slice %48 {offsets = [0, 384], sizes = [8, 128], strides = [1, 1]} : vector<8x512xf32> to vector<8x128xf32>
    %64 = arith.negf %63 : vector<8x128xf32>
    %65 = math.exp %64 : vector<8x128xf32>
    %cst_21 = arith.constant 1.000000e+00 : f32
    %66 = vector.broadcast %cst_21 : f32 to vector<8x128xf32>
    %67 = arith.addf %66, %65 : vector<8x128xf32>
    %68 = arith.divf %66, %67 : vector<8x128xf32>
    %69 = arith.mulf %60, %39 : vector<8x128xf32>
    %70 = arith.mulf %54, %62 : vector<8x128xf32>
    %71 = arith.addf %69, %70 : vector<8x128xf32>
    %72 = math.tanh %71 : vector<8x128xf32>
    %73 = arith.mulf %68, %72 : vector<8x128xf32>
    %c2_i32 = arith.constant 2 : i32
    %c8_i32_22 = arith.constant 8 : i32
    %74 = arith.muli %c2_i32, %c8_i32_22 : i32
    %75 = tpu.assume_multiple %74, 8 : i32
    %76 = arith.index_cast %75 : i32 to index
    %c0_23 = arith.constant 0 : index
    %77 = vector.load %arg8[%76, %c0_23] : memref<64x512xf32, #tpu.memory_space<vmem>>, vector<8x512xf32>
    %78 = arith.truncf %73 : vector<8x128xf32> to vector<8x128xbf16>
    %cst_24 = arith.constant dense<0.000000e+00> : vector<8x512xf32>
    %79 = tpu.matmul %78, %7, %cst_24 {dimension_numbers = #tpu.dot_dimension_numbers<[1], [0], [0], [1], [0, 0, 1, 1], [], []>} : vector<8x128xbf16>, vector<128x512xbf16>, vector<8x512xf32> -> vector<8x512xf32>
    %80 = arith.addf %77, %79 : vector<8x512xf32>
    %81 = vector.extract_strided_slice %80 {offsets = [0, 0], sizes = [8, 128], strides = [1, 1]} : vector<8x512xf32> to vector<8x128xf32>
    %82 = arith.negf %81 : vector<8x128xf32>
    %83 = math.exp %82 : vector<8x128xf32>
    %cst_25 = arith.constant 1.000000e+00 : f32
    %84 = vector.broadcast %cst_25 : f32 to vector<8x128xf32>
    %85 = arith.addf %84, %83 : vector<8x128xf32>
    %86 = arith.divf %84, %85 : vector<8x128xf32>
    %87 = vector.extract_strided_slice %80 {offsets = [0, 128], sizes = [8, 128], strides = [1, 1]} : vector<8x512xf32> to vector<8x128xf32>
    %88 = arith.negf %87 : vector<8x128xf32>
    %89 = math.exp %88 : vector<8x128xf32>
    %cst_26 = arith.constant 1.000000e+00 : f32
    %90 = vector.broadcast %cst_26 : f32 to vector<8x128xf32>
    %91 = arith.addf %90, %89 : vector<8x128xf32>
    %92 = arith.divf %90, %91 : vector<8x128xf32>
    %93 = vector.extract_strided_slice %80 {offsets = [0, 256], sizes = [8, 128], strides = [1, 1]} : vector<8x512xf32> to vector<8x128xf32>
    %94 = math.tanh %93 : vector<8x128xf32>
    %95 = vector.extract_strided_slice %80 {offsets = [0, 384], sizes = [8, 128], strides = [1, 1]} : vector<8x512xf32> to vector<8x128xf32>
    %96 = arith.negf %95 : vector<8x128xf32>
    %97 = math.exp %96 : vector<8x128xf32>
    %cst_27 = arith.constant 1.000000e+00 : f32
    %98 = vector.broadcast %cst_27 : f32 to vector<8x128xf32>
    %99 = arith.addf %98, %97 : vector<8x128xf32>
    %100 = arith.divf %98, %99 : vector<8x128xf32>
    %101 = arith.mulf %92, %71 : vector<8x128xf32>
    %102 = arith.mulf %86, %94 : vector<8x128xf32>
    %103 = arith.addf %101, %102 : vector<8x128xf32>
    %104 = math.tanh %103 : vector<8x128xf32>
    %105 = arith.mulf %100, %104 : vector<8x128xf32>
    %c3_i32 = arith.constant 3 : i32
    %c8_i32_28 = arith.constant 8 : i32
    %106 = arith.muli %c3_i32, %c8_i32_28 : i32
    %107 = tpu.assume_multiple %106, 8 : i32
    %108 = arith.index_cast %107 : i32 to index
    %c0_29 = arith.constant 0 : index
    %109 = vector.load %arg8[%108, %c0_29] : memref<64x512xf32, #tpu.memory_space<vmem>>, vector<8x512xf32>
    %110 = arith.truncf %105 : vector<8x128xf32> to vector<8x128xbf16>
    %cst_30 = arith.constant dense<0.000000e+00> : vector<8x512xf32>
    %111 = tpu.matmul %110, %7, %cst_30 {dimension_numbers = #tpu.dot_dimension_numbers<[1], [0], [0], [1], [0, 0, 1, 1], [], []>} : vector<8x128xbf16>, vector<128x512xbf16>, vector<8x512xf32> -> vector<8x512xf32>
    %112 = arith.addf %109, %111 : vector<8x512xf32>
    %113 = vector.extract_strided_slice %112 {offsets = [0, 0], sizes = [8, 128], strides = [1, 1]} : vector<8x512xf32> to vector<8x128xf32>
    %114 = arith.negf %113 : vector<8x128xf32>
    %115 = math.exp %114 : vector<8x128xf32>
    %cst_31 = arith.constant 1.000000e+00 : f32
    %116 = vector.broadcast %cst_31 : f32 to vector<8x128xf32>
    %117 = arith.addf %116, %115 : vector<8x128xf32>
    %118 = arith.divf %116, %117 : vector<8x128xf32>
    %119 = vector.extract_strided_slice %112 {offsets = [0, 128], sizes = [8, 128], strides = [1, 1]} : vector<8x512xf32> to vector<8x128xf32>
    %120 = arith.negf %119 : vector<8x128xf32>
    %121 = math.exp %120 : vector<8x128xf32>
    %cst_32 = arith.constant 1.000000e+00 : f32
    %122 = vector.broadcast %cst_32 : f32 to vector<8x128xf32>
    %123 = arith.addf %122, %121 : vector<8x128xf32>
    %124 = arith.divf %122, %123 : vector<8x128xf32>
    %125 = vector.extract_strided_slice %112 {offsets = [0, 256], sizes = [8, 128], strides = [1, 1]} : vector<8x512xf32> to vector<8x128xf32>
    %126 = math.tanh %125 : vector<8x128xf32>
    %127 = vector.extract_strided_slice %112 {offsets = [0, 384], sizes = [8, 128], strides = [1, 1]} : vector<8x512xf32> to vector<8x128xf32>
    %128 = arith.negf %127 : vector<8x128xf32>
    %129 = math.exp %128 : vector<8x128xf32>
    %cst_33 = arith.constant 1.000000e+00 : f32
    %130 = vector.broadcast %cst_33 : f32 to vector<8x128xf32>
    %131 = arith.addf %130, %129 : vector<8x128xf32>
    %132 = arith.divf %130, %131 : vector<8x128xf32>
    %133 = arith.mulf %124, %103 : vector<8x128xf32>
    %134 = arith.mulf %118, %126 : vector<8x128xf32>
    %135 = arith.addf %133, %134 : vector<8x128xf32>
    %136 = math.tanh %135 : vector<8x128xf32>
    %137 = arith.mulf %132, %136 : vector<8x128xf32>
    %c4_i32 = arith.constant 4 : i32
    %c8_i32_34 = arith.constant 8 : i32
    %138 = arith.muli %c4_i32, %c8_i32_34 : i32
    %139 = tpu.assume_multiple %138, 8 : i32
    %140 = arith.index_cast %139 : i32 to index
    %c0_35 = arith.constant 0 : index
    %141 = vector.load %arg8[%140, %c0_35] : memref<64x512xf32, #tpu.memory_space<vmem>>, vector<8x512xf32>
    %142 = arith.truncf %137 : vector<8x128xf32> to vector<8x128xbf16>
    %cst_36 = arith.constant dense<0.000000e+00> : vector<8x512xf32>
    %143 = tpu.matmul %142, %7, %cst_36 {dimension_numbers = #tpu.dot_dimension_numbers<[1], [0], [0], [1], [0, 0, 1, 1], [], []>} : vector<8x128xbf16>, vector<128x512xbf16>, vector<8x512xf32> -> vector<8x512xf32>
    %144 = arith.addf %141, %143 : vector<8x512xf32>
    %145 = vector.extract_strided_slice %144 {offsets = [0, 0], sizes = [8, 128], strides = [1, 1]} : vector<8x512xf32> to vector<8x128xf32>
    %146 = arith.negf %145 : vector<8x128xf32>
    %147 = math.exp %146 : vector<8x128xf32>
    %cst_37 = arith.constant 1.000000e+00 : f32
    %148 = vector.broadcast %cst_37 : f32 to vector<8x128xf32>
    %149 = arith.addf %148, %147 : vector<8x128xf32>
    %150 = arith.divf %148, %149 : vector<8x128xf32>
    %151 = vector.extract_strided_slice %144 {offsets = [0, 128], sizes = [8, 128], strides = [1, 1]} : vector<8x512xf32> to vector<8x128xf32>
    %152 = arith.negf %151 : vector<8x128xf32>
    %153 = math.exp %152 : vector<8x128xf32>
    %cst_38 = arith.constant 1.000000e+00 : f32
    %154 = vector.broadcast %cst_38 : f32 to vector<8x128xf32>
    %155 = arith.addf %154, %153 : vector<8x128xf32>
    %156 = arith.divf %154, %155 : vector<8x128xf32>
    %157 = vector.extract_strided_slice %144 {offsets = [0, 256], sizes = [8, 128], strides = [1, 1]} : vector<8x512xf32> to vector<8x128xf32>
    %158 = math.tanh %157 : vector<8x128xf32>
    %159 = vector.extract_strided_slice %144 {offsets = [0, 384], sizes = [8, 128], strides = [1, 1]} : vector<8x512xf32> to vector<8x128xf32>
    %160 = arith.negf %159 : vector<8x128xf32>
    %161 = math.exp %160 : vector<8x128xf32>
    %cst_39 = arith.constant 1.000000e+00 : f32
    %162 = vector.broadcast %cst_39 : f32 to vector<8x128xf32>
    %163 = arith.addf %162, %161 : vector<8x128xf32>
    %164 = arith.divf %162, %163 : vector<8x128xf32>
    %165 = arith.mulf %156, %135 : vector<8x128xf32>
    %166 = arith.mulf %150, %158 : vector<8x128xf32>
    %167 = arith.addf %165, %166 : vector<8x128xf32>
    %168 = math.tanh %167 : vector<8x128xf32>
    %169 = arith.mulf %164, %168 : vector<8x128xf32>
    %c5_i32 = arith.constant 5 : i32
    %c8_i32_40 = arith.constant 8 : i32
    %170 = arith.muli %c5_i32, %c8_i32_40 : i32
    %171 = tpu.assume_multiple %170, 8 : i32
    %172 = arith.index_cast %171 : i32 to index
    %c0_41 = arith.constant 0 : index
    %173 = vector.load %arg8[%172, %c0_41] : memref<64x512xf32, #tpu.memory_space<vmem>>, vector<8x512xf32>
    %174 = arith.truncf %169 : vector<8x128xf32> to vector<8x128xbf16>
    %cst_42 = arith.constant dense<0.000000e+00> : vector<8x512xf32>
    %175 = tpu.matmul %174, %7, %cst_42 {dimension_numbers = #tpu.dot_dimension_numbers<[1], [0], [0], [1], [0, 0, 1, 1], [], []>} : vector<8x128xbf16>, vector<128x512xbf16>, vector<8x512xf32> -> vector<8x512xf32>
    %176 = arith.addf %173, %175 : vector<8x512xf32>
    %177 = vector.extract_strided_slice %176 {offsets = [0, 0], sizes = [8, 128], strides = [1, 1]} : vector<8x512xf32> to vector<8x128xf32>
    %178 = arith.negf %177 : vector<8x128xf32>
    %179 = math.exp %178 : vector<8x128xf32>
    %cst_43 = arith.constant 1.000000e+00 : f32
    %180 = vector.broadcast %cst_43 : f32 to vector<8x128xf32>
    %181 = arith.addf %180, %179 : vector<8x128xf32>
    %182 = arith.divf %180, %181 : vector<8x128xf32>
    %183 = vector.extract_strided_slice %176 {offsets = [0, 128], sizes = [8, 128], strides = [1, 1]} : vector<8x512xf32> to vector<8x128xf32>
    %184 = arith.negf %183 : vector<8x128xf32>
    %185 = math.exp %184 : vector<8x128xf32>
    %cst_44 = arith.constant 1.000000e+00 : f32
    %186 = vector.broadcast %cst_44 : f32 to vector<8x128xf32>
    %187 = arith.addf %186, %185 : vector<8x128xf32>
    %188 = arith.divf %186, %187 : vector<8x128xf32>
    %189 = vector.extract_strided_slice %176 {offsets = [0, 256], sizes = [8, 128], strides = [1, 1]} : vector<8x512xf32> to vector<8x128xf32>
    %190 = math.tanh %189 : vector<8x128xf32>
    %191 = vector.extract_strided_slice %176 {offsets = [0, 384], sizes = [8, 128], strides = [1, 1]} : vector<8x512xf32> to vector<8x128xf32>
    %192 = arith.negf %191 : vector<8x128xf32>
    %193 = math.exp %192 : vector<8x128xf32>
    %cst_45 = arith.constant 1.000000e+00 : f32
    %194 = vector.broadcast %cst_45 : f32 to vector<8x128xf32>
    %195 = arith.addf %194, %193 : vector<8x128xf32>
    %196 = arith.divf %194, %195 : vector<8x128xf32>
    %197 = arith.mulf %188, %167 : vector<8x128xf32>
    %198 = arith.mulf %182, %190 : vector<8x128xf32>
    %199 = arith.addf %197, %198 : vector<8x128xf32>
    %200 = math.tanh %199 : vector<8x128xf32>
    %201 = arith.mulf %196, %200 : vector<8x128xf32>
    %c6_i32 = arith.constant 6 : i32
    %c8_i32_46 = arith.constant 8 : i32
    %202 = arith.muli %c6_i32, %c8_i32_46 : i32
    %203 = tpu.assume_multiple %202, 8 : i32
    %204 = arith.index_cast %203 : i32 to index
    %c0_47 = arith.constant 0 : index
    %205 = vector.load %arg8[%204, %c0_47] : memref<64x512xf32, #tpu.memory_space<vmem>>, vector<8x512xf32>
    %206 = arith.truncf %201 : vector<8x128xf32> to vector<8x128xbf16>
    %cst_48 = arith.constant dense<0.000000e+00> : vector<8x512xf32>
    %207 = tpu.matmul %206, %7, %cst_48 {dimension_numbers = #tpu.dot_dimension_numbers<[1], [0], [0], [1], [0, 0, 1, 1], [], []>} : vector<8x128xbf16>, vector<128x512xbf16>, vector<8x512xf32> -> vector<8x512xf32>
    %208 = arith.addf %205, %207 : vector<8x512xf32>
    %209 = vector.extract_strided_slice %208 {offsets = [0, 0], sizes = [8, 128], strides = [1, 1]} : vector<8x512xf32> to vector<8x128xf32>
    %210 = arith.negf %209 : vector<8x128xf32>
    %211 = math.exp %210 : vector<8x128xf32>
    %cst_49 = arith.constant 1.000000e+00 : f32
    %212 = vector.broadcast %cst_49 : f32 to vector<8x128xf32>
    %213 = arith.addf %212, %211 : vector<8x128xf32>
    %214 = arith.divf %212, %213 : vector<8x128xf32>
    %215 = vector.extract_strided_slice %208 {offsets = [0, 128], sizes = [8, 128], strides = [1, 1]} : vector<8x512xf32> to vector<8x128xf32>
    %216 = arith.negf %215 : vector<8x128xf32>
    %217 = math.exp %216 : vector<8x128xf32>
    %cst_50 = arith.constant 1.000000e+00 : f32
    %218 = vector.broadcast %cst_50 : f32 to vector<8x128xf32>
    %219 = arith.addf %218, %217 : vector<8x128xf32>
    %220 = arith.divf %218, %219 : vector<8x128xf32>
    %221 = vector.extract_strided_slice %208 {offsets = [0, 256], sizes = [8, 128], strides = [1, 1]} : vector<8x512xf32> to vector<8x128xf32>
    %222 = math.tanh %221 : vector<8x128xf32>
    %223 = vector.extract_strided_slice %208 {offsets = [0, 384], sizes = [8, 128], strides = [1, 1]} : vector<8x512xf32> to vector<8x128xf32>
    %224 = arith.negf %223 : vector<8x128xf32>
    %225 = math.exp %224 : vector<8x128xf32>
    %cst_51 = arith.constant 1.000000e+00 : f32
    %226 = vector.broadcast %cst_51 : f32 to vector<8x128xf32>
    %227 = arith.addf %226, %225 : vector<8x128xf32>
    %228 = arith.divf %226, %227 : vector<8x128xf32>
    %229 = arith.mulf %220, %199 : vector<8x128xf32>
    %230 = arith.mulf %214, %222 : vector<8x128xf32>
    %231 = arith.addf %229, %230 : vector<8x128xf32>
    %232 = math.tanh %231 : vector<8x128xf32>
    %233 = arith.mulf %228, %232 : vector<8x128xf32>
    %c7_i32 = arith.constant 7 : i32
    %c8_i32_52 = arith.constant 8 : i32
    %234 = arith.muli %c7_i32, %c8_i32_52 : i32
    %235 = tpu.assume_multiple %234, 8 : i32
    %236 = arith.index_cast %235 : i32 to index
    %c0_53 = arith.constant 0 : index
    %237 = vector.load %arg8[%236, %c0_53] : memref<64x512xf32, #tpu.memory_space<vmem>>, vector<8x512xf32>
    %238 = arith.truncf %233 : vector<8x128xf32> to vector<8x128xbf16>
    %cst_54 = arith.constant dense<0.000000e+00> : vector<8x512xf32>
    %239 = tpu.matmul %238, %7, %cst_54 {dimension_numbers = #tpu.dot_dimension_numbers<[1], [0], [0], [1], [0, 0, 1, 1], [], []>} : vector<8x128xbf16>, vector<128x512xbf16>, vector<8x512xf32> -> vector<8x512xf32>
    %240 = arith.addf %237, %239 : vector<8x512xf32>
    %241 = vector.extract_strided_slice %240 {offsets = [0, 0], sizes = [8, 128], strides = [1, 1]} : vector<8x512xf32> to vector<8x128xf32>
    %242 = arith.negf %241 : vector<8x128xf32>
    %243 = math.exp %242 : vector<8x128xf32>
    %cst_55 = arith.constant 1.000000e+00 : f32
    %244 = vector.broadcast %cst_55 : f32 to vector<8x128xf32>
    %245 = arith.addf %244, %243 : vector<8x128xf32>
    %246 = arith.divf %244, %245 : vector<8x128xf32>
    %247 = vector.extract_strided_slice %240 {offsets = [0, 128], sizes = [8, 128], strides = [1, 1]} : vector<8x512xf32> to vector<8x128xf32>
    %248 = arith.negf %247 : vector<8x128xf32>
    %249 = math.exp %248 : vector<8x128xf32>
    %cst_56 = arith.constant 1.000000e+00 : f32
    %250 = vector.broadcast %cst_56 : f32 to vector<8x128xf32>
    %251 = arith.addf %250, %249 : vector<8x128xf32>
    %252 = arith.divf %250, %251 : vector<8x128xf32>
    %253 = vector.extract_strided_slice %240 {offsets = [0, 256], sizes = [8, 128], strides = [1, 1]} : vector<8x512xf32> to vector<8x128xf32>
    %254 = math.tanh %253 : vector<8x128xf32>
    %255 = vector.extract_strided_slice %240 {offsets = [0, 384], sizes = [8, 128], strides = [1, 1]} : vector<8x512xf32> to vector<8x128xf32>
    %256 = arith.negf %255 : vector<8x128xf32>
    %257 = math.exp %256 : vector<8x128xf32>
    %cst_57 = arith.constant 1.000000e+00 : f32
    %258 = vector.broadcast %cst_57 : f32 to vector<8x128xf32>
    %259 = arith.addf %258, %257 : vector<8x128xf32>
    %260 = arith.divf %258, %259 : vector<8x128xf32>
    %261 = arith.mulf %252, %231 : vector<8x128xf32>
    %262 = arith.mulf %246, %254 : vector<8x128xf32>
    %263 = arith.addf %261, %262 : vector<8x128xf32>
    %264 = math.tanh %263 : vector<8x128xf32>
    %265 = arith.mulf %260, %264 : vector<8x128xf32>
    %c8_i32_58 = arith.constant 8 : i32
    %266 = arith.truncf %265 : vector<8x128xf32> to vector<8x128xbf16>
    %c0_59 = arith.constant 0 : index
    %c0_60 = arith.constant 0 : index
    %267 = vector.load %arg5[%c0_59, %c0_60] : memref<128x128xbf16, #tpu.memory_space<vmem>>, vector<128x128xbf16>
    %cst_61 = arith.constant dense<0.000000e+00> : vector<8x128xf32>
    %268 = tpu.matmul %266, %267, %cst_61 {dimension_numbers = #tpu.dot_dimension_numbers<[1], [0], [0], [1], [0, 0, 1, 1], [], []>} : vector<8x128xbf16>, vector<128x128xbf16>, vector<8x128xf32> -> vector<8x128xf32>
    %c0_62 = arith.constant 0 : index
    %c0_63 = arith.constant 0 : index
    %269 = vector.load %arg6[%c0_62, %c0_63] : memref<1x128xf32, #tpu.memory_space<vmem>>, vector<1x128xf32>
    %270 = vector.broadcast %269 : vector<1x128xf32> to vector<8x128xf32>
    %271 = arith.addf %268, %270 : vector<8x128xf32>
    %c0_64 = arith.constant 0 : index
    %c0_65 = arith.constant 0 : index
    %272 = vector.load %arg7[%c0_64, %c0_65] : memref<8x128xf32, #tpu.memory_space<vmem>>, vector<8x128xf32>
    tpu.vector_store %arg7[%c0_64, %c0_65], %271 {strides = array<i32>} : memref<8x128xf32, #tpu.memory_space<vmem>>, vector<8x128xf32>,
    return
  }
  func.func @transform_0(%arg0: i32) -> (i32, i32) {
    %c0_i32 = arith.constant 0 : i32
    %c0_i32_0 = arith.constant 0 : i32
    %c0_i32_1 = arith.constant 0 : i32
    return %c0_i32, %c0_i32_0 : i32, i32
  }
  func.func @transform_1(%arg0: i32) -> (i32, i32) {
    %c0_i32 = arith.constant 0 : i32
    %c0_i32_0 = arith.constant 0 : i32
    %c0_i32_1 = arith.constant 0 : i32
    return %c0_i32, %c0_i32_0 : i32, i32
  }
  func.func @transform_2(%arg0: i32) -> (i32, i32) {
    %c0_i32 = arith.constant 0 : i32
    %c0_i32_0 = arith.constant 0 : i32
    %c0_i32_1 = arith.constant 0 : i32
    return %c0_i32, %c0_i32_0 : i32, i32
  }
  func.func @transform_3(%arg0: i32) -> (i32, i32) {
    %c0_i32 = arith.constant 0 : i32
    %c0_i32_0 = arith.constant 0 : i32
    %c0_i32_1 = arith.constant 0 : i32
    return %c0_i32, %c0_i32_0 : i32, i32
  }
  func.func @transform_4(%arg0: i32) -> (i32, i32) {
    %c0_i32 = arith.constant 0 : i32
    %c0_i32_0 = arith.constant 0 : i32
    %c0_i32_1 = arith.constant 0 : i32
    return %c0_i32, %c0_i32_0 : i32, i32
  }
  func.func @transform_5(%arg0: i32) -> (i32, i32) {
    %c0_i32 = arith.constant 0 : i32
    %c0_i32_0 = arith.constant 0 : i32
    %c0_i32_1 = arith.constant 0 : i32
    return %c0_i32, %c0_i32_0 : i32, i32
  }
  func.func @transform_6(%arg0: i32) -> (i32, i32) {
    %c0_i32 = arith.constant 0 : i32
    %c0_i32_0 = arith.constant 0 : i32
    %c0_i32_1 = arith.constant 0 : i32
    return %c0_i32, %c0_i32_0 : i32, i32
  }
}

</mosaic_0001>

<bundles_post_ra>
// kernel: tpu_custom_call.1
= control target key start
LH: loop header
LB: loop body
LE: loop exit
PB: predicated region body
PF: predicated region fallthrough
CT: control target
= control target key end

     0   :  { %11 = vsyncpa [#allocation4], 0  ;;  %s2919_s0 = inlined_call_operand.hbm [shape: bf16[64,128], index: 0, kind: input, shape index: {}]   ;;  %s2920_s1 = inlined_call_operand.hbm [shape: bf16[128,512], index: 1, kind: input, shape index: {}]   ;;  %s2921_s2 = inlined_call_operand.hbm [shape: f32[1,512], index: 2, kind: input, shape index: {}]   ;;  %s2922_s3 = inlined_call_operand.hbm [shape: bf16[128,512], index: 3, kind: input, shape index: {}]   ;;  %s2923_s4 = inlined_call_operand.hbm [shape: bf16[128,128], index: 4, kind: input, shape index: {}]   ;;  %s2924_s5 = inlined_call_operand.vmem [shape: f32[1,128], index: 5, kind: input, shape index: {}]   ;;  %s2925_s6 = inlined_call_operand.hbm [shape: f32[8,128], index: 6, kind: output, shape index: {}]  }
   0x1   :  { %12 = vsyncpa [#allocation7], 0 }
   0x2   :  { %13 = vsyncpa [#allocation10], 0 }
   0x3   :  { %14 = vsyncpa [#allocation5], 0  ;;  %s2326_s21 = smov [#allocation6]  }
   0x4   :  { %s32_s22 = sshll.u32 %s2326_s21, 4  ;;  %s33_s22 = int_to_ptr.vmem [resolvable:$true] %s32_s22 }
   0x5   :  { %s2206_s23 = scalar_lea.vmem %s33_s22, 4096  ;;  %p2211_p1 = scmp.lt.s32.totalorder %s33_s22, %s33_s22 }
   0x6   :  { %p2207_p0 = scmp.ne.s32.totalorder %s33_s22, %s2206_s23  ;;  %p2212_p2 = scmp.lt.s32.totalorder %s2206_s23, %s2206_s23 }
   0x8   :  { %p2213_p3 = por %p2212_p2, %p2211_p1 }
   0xa   :  { %p2214_p4 = pnand %p2213_p3, %p2207_p0 }
   0xc   :  { %2217 = shalt.err (!%p2214_p4)
}
   0xd   :  { %s2327_s24 = smov 256   ;;  %s2328_s25 = smov 16  }
   0xe   :  { %38 = dma.hbm_to_vmem [thread:$0]  %s2920_s1, 4096, %s33_s22, [#allocation7], %s2327_s24, %s2327_s24, %s2328_s25  }
   0xf   :  { %s2329_s28 = smov [#allocation9]   ;;  %s2330_s30 = smov [#allocation3]  }
  0x10   :  { %s54_s29 = sshll.u32 %s2329_s28, 4  ;;  %s20_s7 = sshll.u32 %s2330_s30, 4  ;;  %s55_s29 = int_to_ptr.vmem [resolvable:$true] %s54_s29  ;;  %s21_s7 = int_to_ptr.vmem [resolvable:$true] %s20_s7 }
  0x11   :  { %s2226_s8 = scalar_lea.vmem %s55_s29, 4096  ;;  %p2231_p6 = scmp.lt.s32.totalorder %s55_s29, %s55_s29 }
  0x12   :  { %p2227_p5 = scmp.ne.s32.totalorder %s55_s29, %s2226_s8  ;;  %p2232_p7 = scmp.lt.s32.totalorder %s2226_s8, %s2226_s8 }
  0x14   :  { %p2233_p8 = por %p2232_p7, %p2231_p6 }
  0x16   :  { %p2234_p9 = pnand %p2233_p8, %p2227_p5 }
  0x18   :  { %2237 = shalt.err (!%p2234_p9)
}
  0x19   :  { %60 = dma.hbm_to_vmem [thread:$0]  %s2922_s3, 4096, %s55_s29, [#allocation10], %s2327_s24, %s2327_s24, %s2328_s25  }
  0x1a   :  { %s2246_s11 = scalar_lea.vmem %s21_s7, 512  ;;  %p2251_p11 = scmp.lt.s32.totalorder %s21_s7, %s21_s7 }
  0x1b   :  { %p2247_p10 = scmp.ne.s32.totalorder %s21_s7, %s2246_s11  ;;  %p2252_p12 = scmp.lt.s32.totalorder %s2246_s11, %s2246_s11 }
  0x1d   :  { %p2253_p13 = por %p2252_p12, %p2251_p11 }
  0x1f   :  { %p2254_p0 = pnand %p2253_p13, %p2247_p10 }
  0x21   :  { %2257 = shalt.err (!%p2254_p0)
}
  0x22   :  { %s2331_s1 = smov 64   ;;  %s2332_s12 = smov 4  }
  0x23   :  { %26 = dma.hbm_to_vmem [thread:$0]  %s2919_s0, 512, %s21_s7, [#allocation4], %s2331_s1, %s2331_s1, %s2332_s12  }
  0x24   :  { %s2333_s15 = smov [#allocation8]   ;;  %s2334_s17 = smov [#allocation11]  }
  0x25   :  { %s45_s16 = sshll.u32 %s2333_s15, 4  ;;  %s66_s18 = sshll.u32 %s2334_s17, 4  ;;  %s46_s16 = int_to_ptr.vmem [resolvable:$true] %s45_s16  ;;  %s67_s18 = int_to_ptr.vmem [resolvable:$true] %s66_s18 }
  0x26   :  { %s2266_s3 = scalar_lea.vmem %s46_s16, 64  ;;  %p2271_p2 = scmp.lt.s32.totalorder %s46_s16, %s46_s16 }
  0x27   :  { %p2267_p1 = scmp.ne.s32.totalorder %s46_s16, %s2266_s3  ;;  %p2272_p3 = scmp.lt.s32.totalorder %s2266_s3, %s2266_s3 }
  0x29   :  { %p2273_p4 = por %p2272_p3, %p2271_p2 }
  0x2b   :  { %p2274_p5 = pnand %p2273_p4, %p2267_p1 }
  0x2d   :  { %2277 = shalt.err (!%p2274_p5)
}
  0x2e   :  { %48 = dma.hbm_to_vmem [thread:$0]  %s2921_s2, 64, %s46_s16, [#allocation7]  }
  0x2f   :  { %s2286_s21 = scalar_lea.vmem %s67_s18, 1024  ;;  %p2291_p7 = scmp.lt.s32.totalorder %s67_s18, %s67_s18 }
  0x30   :  { %p2287_p6 = scmp.ne.s32.totalorder %s67_s18, %s2286_s21  ;;  %p2292_p8 = scmp.lt.s32.totalorder %s2286_s21, %s2286_s21 }
  0x32   :  { %p2293_p9 = por %p2292_p8, %p2291_p7 }
  0x34   :  { %p2294_p10 = pnand %p2293_p9, %p2287_p6 }
  0x36   :  { %2297 = shalt.err (!%p2294_p10)
}
  0x37   :  { %72 = dma.hbm_to_vmem [thread:$0]  %s2923_s4, 1024, %s67_s18, [#allocation10], %s2331_s1, %s2331_s1, %s2332_s12  }
  0x38   :  { %2318 = dma.done.wait [#allocation4], 512  }
  0x39   :  { %2319 = vsyncadd [#allocation4], 4294966784 }
  0x3a   :  { %2320 = dma.done.wait [#allocation7], 4160  }
  0x3b   :  { %2321 = vsyncadd [#allocation7], 4294963136 }
  0x3c   :  { %2322 = dma.done.wait [#allocation10], 5120  }
  0x3d   :  { %2323 = vsyncadd [#allocation10], 4294962176  ;;  %v2926_v0 = vmov 0   ;;  %v1930_v1 = vld [vmem:[#allocation6 + $0xe4] ss:$16 sps:$4 sm:$0xff]   ;;  %v1991_v44 = vld [vmem:[#allocation3 + $0x8] sm:$0xff]  }
  0x3e   :  { %369 = vmatprep.mubr.bf16.mxu0 %v2926_v0  ;;  %442 = vmatprep.mubr.bf16.mxu1 %v2926_v0  ;;  %v1932_v2 = vld [vmem:[#allocation6 + $0xec] ss:$16 sps:$4 sm:$0xff]   ;;  %v1934_v3 = vld [vmem:[#allocation6 + $0xe0] ss:$16 sps:$4 sm:$0xff]   ;;  %v1935_v4 = vld [vmem:[#allocation6 + $0xe8] ss:$16 sps:$4 sm:$0xff]  }
  0x3f   :  { %337 = vmatprep.subr.bf16.mxu0 %v1930_v1  ;;  %410 = vmatprep.subr.bf16.mxu1 %v1932_v2  ;;  %v1936_v5 = vld [vmem:[#allocation6 + $0xc4] ss:$16 sps:$4 sm:$0xff]   ;;  %v1938_v6 = vld [vmem:[#allocation6 + $0xcc] ss:$16 sps:$4 sm:$0xff]   ;;  %v1940_v7 = vld [vmem:[#allocation6 + $0xc0] ss:$16 sps:$4 sm:$0xff]  }
  0x40   :  { %338 = vmatpush1.bf16.msra.mxu0 %v1934_v3  ;;  %411 = vmatpush1.bf16.msra.mxu1 %v1935_v4  ;;  %v1941_v8 = vld [vmem:[#allocation6 + $0xc8] ss:$16 sps:$4 sm:$0xff]   ;;  %v1942_v9 = vld [vmem:[#allocation6 + $0xa4] ss:$16 sps:$4 sm:$0xff]   ;;  %v1944_v10 = vld [vmem:[#allocation6 + $0xac] ss:$16 sps:$4 sm:$0xff]  }
  0x41   :  { %339 = vmatprep.subr.bf16.mxu0 %v1936_v5  ;;  %412 = vmatprep.subr.bf16.mxu1 %v1938_v6  ;;  %v1946_v11 = vld [vmem:[#allocation6 + $0xa0] ss:$16 sps:$4 sm:$0xff]   ;;  %v1947_v12 = vld [vmem:[#allocation6 + $0xa8] ss:$16 sps:$4 sm:$0xff]   ;;  %v1948_v13 = vld [vmem:[#allocation6 + $0x84] ss:$16 sps:$4 sm:$0xff]   ;;  %v133_v6 = vlaneseq }
  0x42   :  { %v1950_v14 = vld [vmem:[#allocation6 + $0x8c] ss:$16 sps:$4 sm:$0xff]   ;;  %v1952_v15 = vld [vmem:[#allocation6 + $0x80] ss:$16 sps:$4 sm:$0xff]   ;;  %v1953_v16 = vld [vmem:[#allocation6 + $0x88] ss:$16 sps:$4 sm:$0xff]  }
  0x43   :  { %v1954_v17 = vld [vmem:[#allocation6 + $0x64] ss:$16 sps:$4 sm:$0xff]   ;;  %v1956_v18 = vld [vmem:[#allocation6 + $0x6c] ss:$16 sps:$4 sm:$0xff]   ;;  %v1958_v19 = vld [vmem:[#allocation6 + $0x60] ss:$16 sps:$4 sm:$0xff]  }
  0x44   :  { %340 = vmatpush1.bf16.msra.mxu0 %v1940_v7  ;;  %413 = vmatpush1.bf16.msra.mxu1 %v1941_v8  ;;  %v1959_v20 = vld [vmem:[#allocation6 + $0x68] ss:$16 sps:$4 sm:$0xff]   ;;  %v1960_v21 = vld [vmem:[#allocation6 + $0x44] ss:$16 sps:$4 sm:$0xff]   ;;  %v1962_v22 = vld [vmem:[#allocation6 + $0x4c] ss:$16 sps:$4 sm:$0xff]  }
  0x45   :  { %341 = vmatprep.subr.bf16.mxu0 %v1942_v9  ;;  %414 = vmatprep.subr.bf16.mxu1 %v1944_v10  ;;  %v1964_v23 = vld [vmem:[#allocation6 + $0x40] ss:$16 sps:$4 sm:$0xff]   ;;  %v1965_v24 = vld [vmem:[#allocation6 + $0x48] ss:$16 sps:$4 sm:$0xff]   ;;  %v1966_v25 = vld [vmem:[#allocation6 + $0x24] ss:$16 sps:$4 sm:$0xff]  }
  0x46   :  { %v1968_v26 = vld [vmem:[#allocation6 + $0x2c] ss:$16 sps:$4 sm:$0xff]   ;;  %v1970_v27 = vld [vmem:[#allocation6 + $0x20] ss:$16 sps:$4 sm:$0xff]   ;;  %v1971_v28 = vld [vmem:[#allocation6 + $0x28] ss:$16 sps:$4 sm:$0xff]  }
  0x47   :  { %v1972_v29 = vld [vmem:[#allocation6 + $0x4] ss:$16 sps:$4 sm:$0xff]   ;;  %v1974_v30 = vld [vmem:[#allocation6 + $0xc] ss:$16 sps:$4 sm:$0xff]   ;;  %v1976_v31 = vld [vmem:[#allocation6] ss:$16 sps:$4 sm:$0xff]  }
  0x48   :  { %342 = vmatpush1.bf16.msra.mxu0 %v1946_v11  ;;  %415 = vmatpush1.bf16.msra.mxu1 %v1947_v12  ;;  %v1977_v32 = vld [vmem:[#allocation6 + $0x8] ss:$16 sps:$4 sm:$0xff]   ;;  %v2393_v34 = vld [vmem:[#allocation9 + $0xec] ss:$16 sps:$4 sm:$0xff]   ;;  %v2395_v36 = vld [vmem:[#allocation9 + $0xe0] ss:$16 sps:$4 sm:$0xff]  }
  0x49   :  { %343 = vmatprep.subr.bf16.mxu0 %v1948_v13  ;;  %416 = vmatprep.subr.bf16.mxu1 %v1950_v14  ;;  %v2391_v33 = vld [vmem:[#allocation9 + $0xe4] ss:$16 sps:$4 sm:$0xff]   ;;  %v1978_v35 = vld [vmem:[#allocation3] sm:$0xff]   ;;  %v2397_v37 = vld [vmem:[#allocation9 + $0xe8] ss:$16 sps:$4 sm:$0xff]   ;;  %v134_v7 = vshrl.u32 %v133_v6, 7 }
  0x4a   :  { %v2401_v38 = vld [vmem:[#allocation9 + $0xc4] ss:$16 sps:$4 sm:$0xff]   ;;  %v2403_v39 = vld [vmem:[#allocation9 + $0xcc] ss:$16 sps:$4 sm:$0xff]   ;;  %v2405_v40 = vld [vmem:[#allocation9 + $0xc0] ss:$16 sps:$4 sm:$0xff]  }
  0x4b   :  { %v2409_v41 = vld [vmem:[#allocation9 + $0xc8] ss:$16 sps:$4 sm:$0xff]   ;;  %v2413_v42 = vld [vmem:[#allocation9 + $0xa4] ss:$16 sps:$4 sm:$0xff]   ;;  %v2415_v43 = vld [vmem:[#allocation9 + $0xac] ss:$16 sps:$4 sm:$0xff]  }
  0x4c   :  { %344 = vmatpush1.bf16.msra.mxu0 %v1952_v15  ;;  %417 = vmatpush1.bf16.msra.mxu1 %v1953_v16  ;;  %v2419_v45 = vld [vmem:[#allocation9 + $0xa0] ss:$16 sps:$4 sm:$0xff]   ;;  %v2421_v46 = vld [vmem:[#allocation9 + $0xa8] ss:$16 sps:$4 sm:$0xff]   ;;  %v2425_v47 = vld [vmem:[#allocation9 + $0x84] ss:$16 sps:$4 sm:$0xff]  }
  0x4d   :  { %345 = vmatprep.subr.bf16.mxu0 %v1954_v17  ;;  %418 = vmatprep.subr.bf16.mxu1 %v1956_v18  ;;  %v2429_v48 = vld [vmem:[#allocation9 + $0x8c] ss:$16 sps:$4 sm:$0xff]   ;;  %v2431_v49 = vld [vmem:[#allocation9 + $0x80] ss:$16 sps:$4 sm:$0xff]   ;;  %v2433_v50 = vld [vmem:[#allocation9 + $0x88] ss:$16 sps:$4 sm:$0xff]  }
  0x4e   :  { %v2437_v51 = vld [vmem:[#allocation9 + $0x64] ss:$16 sps:$4 sm:$0xff]   ;;  %v2441_v52 = vld [vmem:[#allocation9 + $0x6c] ss:$16 sps:$4 sm:$0xff]   ;;  %v2445_v54 = vld [vmem:[#allocation9 + $0x60] ss:$16 sps:$4 sm:$0xff]  }
  0x4f   :  { %v2004_v53 = vld [vmem:[#allocation3 + $0x10] sm:$0xff]   ;;  %v2447_v55 = vld [vmem:[#allocation9 + $0x68] ss:$16 sps:$4 sm:$0xff]   ;;  %v2449_v56 = vld [vmem:[#allocation9 + $0x44] ss:$16 sps:$4 sm:$0xff]   ;;  %v143_v8 = vsub.s32 2, %v134_v7 }
  0x50   :  { %346 = vmatpush1.bf16.msra.mxu0 %v1958_v19  ;;  %419 = vmatpush1.bf16.msra.mxu1 %v1959_v20  ;;  %v2451_v57 = vld [vmem:[#allocation9 + $0x4c] ss:$16 sps:$4 sm:$0xff]   ;;  %v2459_v58 = vld [vmem:[#allocation9 + $0x40] ss:$16 sps:$4 sm:$0xff]   ;;  %v2461_v59 = vld [vmem:[#allocation9 + $0x48] ss:$16 sps:$4 sm:$0xff]  }
  0x51   :  { %347 = vmatprep.subr.bf16.mxu0 %v1960_v21  ;;  %420 = vmatprep.subr.bf16.mxu1 %v1962_v22  ;;  %v2465_v60 = vld [vmem:[#allocation9 + $0x24] ss:$16 sps:$4 sm:$0xff]   ;;  %v2467_v61 = vld [vmem:[#allocation9 + $0x2c] ss:$16 sps:$4 sm:$0xff]   ;;  %v2473_v63 = vld [vmem:[#allocation9 + $0x20] ss:$16 sps:$4 sm:$0xff]  }
  0x52   :  { %v2017_v62 = vld [vmem:[#allocation3 + $0x18] sm:$0xff]   ;;  %v2481_v3 = vld [vmem:[#allocation9 + $0xc] ss:$16 sps:$4 sm:$0xff]   ;;  %v2485_v4 = vld [vmem:[#allocation9] ss:$16 sps:$4 sm:$0xff]   ;;  %v135_v9 = vsub.s32 0, %v134_v7 }
  0x53   :  { %v2475_v1 = vld [vmem:[#allocation9 + $0x28] ss:$16 sps:$4 sm:$0xff]   ;;  %v2479_v2 = vld [vmem:[#allocation9 + $0x4] ss:$16 sps:$4 sm:$0xff]   ;;  %v147_v10 = vsub.s32 3, %v134_v7  ;;  %v139_v15 = vsub.s32 1, %v134_v7 }
  0x54   :  { %348 = vmatpush1.bf16.msra.mxu0 %v1964_v23  ;;  %421 = vmatpush1.bf16.msra.mxu1 %v1965_v24  ;;  %v2487_v5 = vld [vmem:[#allocation9 + $0x8] ss:$16 sps:$4 sm:$0xff]   ;;  %v131_v11 = vld [vmem:[#allocation8] sm:$0xf]  ;;  %vm2337_vm0 = vmmov 0   ;;  %s2338_s23 = smov [#allocation12]  }
  0x55   :  { %349 = vmatprep.subr.bf16.mxu0 %v1966_v25  ;;  %422 = vmatprep.subr.bf16.mxu1 %v1968_v26  ;;  %v2537_v14 = vrot.slane %v131_v11, %v143_v8  ;;  %v136_v18 = vrot.slane %v131_v11, %v135_v9  ;;  %v2543_v19 = vrot.slane %v131_v11, %v147_v10  ;;  %s1769_s24 = sshll.u32 %s2338_s23, 4  ;;  %s1770_s24 = int_to_ptr.vmem [resolvable:$true] %s1769_s24 }
  0x56   :  { %v140_v22 = vrot.slane %v131_v11, %v139_v15  ;;  %s2298_s25 = scalar_lea.vmem %s1770_s24, 128  ;;  %p2303_p12 = scmp.lt.s32.totalorder %s1770_s24, %s1770_s24 }
  0x57   :  { %p2299_p11 = scmp.ne.s32.totalorder %s1770_s24, %s2298_s25  ;;  %p2304_p13 = scmp.lt.s32.totalorder %s2298_s25, %s2298_s25 }
  0x58   :  { %350 = vmatpush1.bf16.msra.mxu0 %v1970_v27  ;;  %423 = vmatpush1.bf16.msra.mxu1 %v1971_v28 }
  0x59   :  { %351 = vmatprep.subr.bf16.mxu0 %v1972_v29  ;;  %424 = vmatprep.subr.bf16.mxu1 %v1974_v30  ;;  %p2305_p0 = por %p2304_p13, %p2303_p12 }
  0x5b   :  { %p2306_p1 = pnand %p2305_p0, %p2299_p11 }
  0x5c   :  { %352 = vmatpush1.bf16.msra.mxu0 %v1976_v31  ;;  %425 = vmatpush1.bf16.msra.mxu1 %v1977_v32 }
  0x5d   :  { %714 = vmatprep.subr.bf16.mxu0 %v2391_v33  ;;  %755 = vmatprep.subr.bf16.mxu1 %v2393_v34 }
  0x5f   :  { %370 = vmatmul.mubr.bf16.vlgmr.msra.gmra.mxu0 %v1978_v35  ;;  %443 = vmatmul.mubr.bf16.vlgmr.msra.gmra.mxu1 %v1978_v35 }
  0x60   :  { %715 = vmatpush1.bf16.msra.mxu0 %v2395_v36  ;;  %756 = vmatpush1.bf16.msra.mxu1 %v2397_v37 }
  0x61   :  { %716 = vmatprep.subr.bf16.mxu0 %v2401_v38  ;;  %757 = vmatprep.subr.bf16.mxu1 %v2403_v39 }
  0x62   :  { %379 = vmatprep.mubr.bf16.mxu0 %v2926_v0  ;;  %452 = vmatprep.mubr.bf16.mxu1 %v2926_v0 }
  0x64   :  { %717 = vmatpush1.bf16.msra.mxu0 %v2405_v40  ;;  %758 = vmatpush1.bf16.msra.mxu1 %v2409_v41 }
  0x65   :  { %718 = vmatprep.subr.bf16.mxu0 %v2413_v42  ;;  %759 = vmatprep.subr.bf16.mxu1 %v2415_v43 }
  0x67   :  { %380 = vmatmul.mubr.bf16.gmra.mxu0 %v1991_v44  ;;  %453 = vmatmul.mubr.bf16.gmra.mxu1 %v1991_v44 }
  0x68   :  { %719 = vmatpush1.bf16.msra.mxu0 %v2419_v45  ;;  %760 = vmatpush1.bf16.msra.mxu1 %v2421_v46 }
  0x69   :  { %720 = vmatprep.subr.bf16.mxu0 %v2425_v47  ;;  %761 = vmatprep.subr.bf16.mxu1 %v2429_v48 }
  0x6a   :  { %389 = vmatprep.mubr.bf16.mxu0 %v2926_v0  ;;  %462 = vmatprep.mubr.bf16.mxu1 %v2926_v0 }
  0x6c   :  { %721 = vmatpush1.bf16.msra.mxu0 %v2431_v49  ;;  %762 = vmatpush1.bf16.msra.mxu1 %v2433_v50 }
  0x6d   :  { %722 = vmatprep.subr.bf16.mxu0 %v2437_v51  ;;  %763 = vmatprep.subr.bf16.mxu1 %v2441_v52 }
  0x6f   :  { %390 = vmatmul.mubr.bf16.gmra.mxu0 %v2004_v53  ;;  %463 = vmatmul.mubr.bf16.gmra.mxu1 %v2004_v53 }
  0x70   :  { %723 = vmatpush1.bf16.msra.mxu0 %v2445_v54  ;;  %764 = vmatpush1.bf16.msra.mxu1 %v2447_v55 }
  0x71   :  { %724 = vmatprep.subr.bf16.mxu0 %v2449_v56  ;;  %765 = vmatprep.subr.bf16.mxu1 %v2451_v57 }
  0x72   :  { %399 = vmatprep.mubr.bf16.mxu0 %v2926_v0  ;;  %472 = vmatprep.mubr.bf16.mxu1 %v2926_v0 }
  0x74   :  { %725 = vmatpush1.bf16.msra.mxu0 %v2459_v58  ;;  %766 = vmatpush1.bf16.msra.mxu1 %v2461_v59 }
  0x75   :  { %726 = vmatprep.subr.bf16.mxu0 %v2465_v60  ;;  %767 = vmatprep.subr.bf16.mxu1 %v2467_v61 }
  0x77   :  { %400 = vmatmul.mubr.bf16.gmra.mxu0 %v2017_v62  ;;  %473 = vmatmul.mubr.bf16.gmra.mxu1 %v2017_v62 }
  0x78   :  { %727 = vmatpush1.bf16.msra.mxu0 %v2473_v63  ;;  %768 = vmatpush1.bf16.msra.mxu1 %v2475_v1 }
  0x79   :  { %728 = vmatprep.subr.bf16.mxu0 %v2479_v2  ;;  %769 = vmatprep.subr.bf16.mxu1 %v2481_v3 }
  0x7a   :  { %746 = vmatprep.mubr.bf16.mxu0 %v2926_v0  ;;  %787 = vmatprep.mubr.bf16.mxu1 %v2926_v0 }
  0x7c   :  { %729 = vmatpush1.bf16.msra.mxu0 %v2485_v4  ;;  %770 = vmatpush1.bf16.msra.mxu1 %v2487_v5 }
  0x7d   :  { %832 = vmatprep.subr.bf16.mxu0 %v2391_v33  ;;  %873 = vmatprep.subr.bf16.mxu1 %v2393_v34 }
  0x7f   :  { %747 = vmatmul.mubr.bf16.vlgmr.msra.gmra.mxu0 %v2926_v0  ;;  %788 = vmatmul.mubr.bf16.vlgmr.msra.gmra.mxu1 %v2926_v0 }
  0x80   :  { %833 = vmatpush1.bf16.msra.mxu0 %v2395_v36  ;;  %874 = vmatpush1.bf16.msra.mxu1 %v2397_v37 }
  0x81   :  { %834 = vmatprep.subr.bf16.mxu0 %v2401_v38  ;;  %875 = vmatprep.subr.bf16.mxu1 %v2403_v39 }
  0x82   :  { %864 = vmatprep.mubr.bf16.mxu0 %v2926_v0  ;;  %905 = vmatprep.mubr.bf16.mxu1 %v2926_v0 }
  0x84   :  { %835 = vmatpush1.bf16.msra.mxu0 %v2405_v40  ;;  %876 = vmatpush1.bf16.msra.mxu1 %v2409_v41 }
  0x85   :  { %836 = vmatprep.subr.bf16.mxu0 %v2413_v42  ;;  %877 = vmatprep.subr.bf16.mxu1 %v2415_v43 }
  0x88   :  { %837 = vmatpush1.bf16.msra.mxu0 %v2419_v45  ;;  %878 = vmatpush1.bf16.msra.mxu1 %v2421_v46 }
  0x89   :  { %838 = vmatprep.subr.bf16.mxu0 %v2425_v47  ;;  %879 = vmatprep.subr.bf16.mxu1 %v2429_v48 }
  0x8c   :  { %839 = vmatpush1.bf16.msra.mxu0 %v2431_v49  ;;  %880 = vmatpush1.bf16.msra.mxu1 %v2433_v50 }
  0x8d   :  { %840 = vmatprep.subr.bf16.mxu0 %v2437_v51  ;;  %881 = vmatprep.subr.bf16.mxu1 %v2441_v52 }
  0x90   :  { %841 = vmatpush1.bf16.msra.mxu0 %v2445_v54  ;;  %882 = vmatpush1.bf16.msra.mxu1 %v2447_v55 }
  0x91   :  { %842 = vmatprep.subr.bf16.mxu0 %v2449_v56  ;;  %883 = vmatprep.subr.bf16.mxu1 %v2451_v57 }
  0x94   :  { %843 = vmatpush1.bf16.msra.mxu0 %v2459_v58  ;;  %884 = vmatpush1.bf16.msra.mxu1 %v2461_v59 }
  0x95   :  { %844 = vmatprep.subr.bf16.mxu0 %v2465_v60  ;;  %885 = vmatprep.subr.bf16.mxu1 %v2467_v61 }
  0x98   :  { %845 = vmatpush1.bf16.msra.mxu0 %v2473_v63  ;;  %886 = vmatpush1.bf16.msra.mxu1 %v2475_v1 }
  0x99   :  { %846 = vmatprep.subr.bf16.mxu0 %v2479_v2  ;;  %887 = vmatprep.subr.bf16.mxu1 %v2481_v3 }
  0x9c   :  { %847 = vmatpush1.bf16.msra.mxu0 %v2485_v4  ;;  %888 = vmatpush1.bf16.msra.mxu1 %v2487_v5 }
  0x9d   :  { %950 = vmatprep.subr.bf16.mxu0 %v2391_v33  ;;  %991 = vmatprep.subr.bf16.mxu1 %v2393_v34 }
 0x11f   :  { %v2533_v12 = vpop.f32.mrf.mxu0  ;;  %v2535_v13 = vpop.f32.mrf.mxu1 }
 0x121   :  { %v2539_v16 = vpop.f32.mrf.mxu0  ;;  %v2541_v17 = vpop.f32.mrf.mxu1 }
 0x123   :  { %v375_v20 = vpop.f32.mrf.mxu0  ;;  %v448_v21 = vpop.f32.mrf.mxu1 }
 0x124   :  { %v2545_v23 = vadd.f32 %v375_v20, %v136_v18  ;;  %v2548_v24 = vadd.f32 %v448_v21, %v2537_v14 }
 0x125   :  { %v377_v25 = vpop.f32.mrf.mxu0  ;;  %v450_v26 = vpop.f32.mrf.mxu1 }
 0x126   :  { %v2550_v27 = vadd.f32 %v377_v25, %v140_v22  ;;  %v2553_v28 = vadd.f32 %v450_v26, %v2543_v19 }
 0x127   :  { %v381_v29 = vpop.f32.mrf.mxu0  ;;  %v454_v30 = vpop.f32.mrf.mxu1 }
 0x128   :  { %v2555_v31 = vadd.f32 %v381_v29, %v136_v18  ;;  %v2558_v32 = vadd.f32 %v454_v30, %v2537_v14 }
 0x129   :  { %v383_v35 = vpop.f32.mrf.mxu0  ;;  %v456_v44 = vpop.f32.mrf.mxu1 }
 0x12a   :  { %2928 = vst [vmem:[#allocation17_spill] sm:$0xff] %v2558_v32  ;;  %v2560_v53 = vadd.f32 %v383_v35, %v140_v22  ;;  %v2563_v62 = vadd.f32 %v456_v44, %v2543_v19 }
 0x12b   :  { %v385_v6 = vpop.f32.mrf.mxu0  ;;  %v458_v7 = vpop.f32.mrf.mxu1 }
 0x12c   :  { %v2565_v8 = vadd.f32 %v385_v6, %v136_v18  ;;  %v2568_v9 = vadd.f32 %v458_v7, %v2537_v14 }
 0x12d   :  { %v387_v10 = vpop.f32.mrf.mxu0  ;;  %v460_v11 = vpop.f32.mrf.mxu1 }
 0x12e   :  { %2929 = vst [vmem:[#allocation18_spill] sm:$0xff] %v2565_v8  ;;  %2930 = vst [vmem:[#allocation19_spill] sm:$0xff] %v2568_v9  ;;  %v2570_v15 = vadd.f32 %v387_v10, %v140_v22  ;;  %v2573_v20 = vadd.f32 %v460_v11, %v2543_v19 }
 0x12f   :  { %v391_v21 = vpop.f32.mrf.mxu0  ;;  %v464_v25 = vpop.f32.mrf.mxu1 }
 0x130   :  { %2931 = vst [vmem:[#allocation20_spill] sm:$0xff] %v2570_v15  ;;  %2932 = vst [vmem:[#allocation21_spill] sm:$0xff] %v2573_v20  ;;  %v2575_v26 = vadd.f32 %v391_v21, %v136_v18  ;;  %v2578_v29 = vadd.f32 %v464_v25, %v2537_v14 }
 0x131   :  { %v393_v30 = vpop.f32.mrf.mxu0  ;;  %v466_v35 = vpop.f32.mrf.mxu1 }
 0x132   :  { %2933 = vst [vmem:[#allocation22_spill] sm:$0xff] %v2575_v26  ;;  %2934 = vst [vmem:[#allocation23_spill] sm:$0xff] %v2578_v29  ;;  %v2580_v44 = vadd.f32 %v393_v30, %v140_v22  ;;  %v2583_v6 = vadd.f32 %v466_v35, %v2543_v19 }
 0x133   :  { %v395_v7 = vpop.f32.mrf.mxu0  ;;  %v468_v10 = vpop.f32.mrf.mxu1 }
 0x134   :  { %2935 = vst [vmem:[#allocation24_spill] sm:$0xff] %v2580_v44  ;;  %2936 = vst [vmem:[#allocation25_spill] sm:$0xff] %v2583_v6  ;;  %v2585_v0 = vadd.f32 %v395_v7, %v136_v18  ;;  %v2588_v11 = vadd.f32 %v468_v10, %v2537_v14 }
 0x135   :  { %v397_v9 = vpop.f32.mrf.mxu0  ;;  %v470_v21 = vpop.f32.mrf.mxu1 }
 0x136   :  { %2937 = vst [vmem:[#allocation26_spill] sm:$0xff] %v2585_v0  ;;  %2938 = vst [vmem:[#allocation27_spill] sm:$0xff] %v2588_v11  ;;  %v2590_v26 = vadd.f32 %v397_v9, %v140_v22  ;;  %v2593_v25 = vadd.f32 %v470_v21, %v2543_v19 }
 0x137   :  { %v401_v29 = vpop.f32.mrf.mxu0  ;;  %v474_v30 = vpop.f32.mrf.mxu1 }
 0x138   :  { %2939 = vst [vmem:[#allocation28_spill] sm:$0xff] %v2590_v26  ;;  %2940 = vst [vmem:[#allocation29_spill] sm:$0xff] %v2593_v25  ;;  %v2595_v44 = vadd.f32 %v401_v29, %v136_v18  ;;  %v2598_v35 = vadd.f32 %v474_v30, %v2537_v14 }
 0x139   :  { %v403_v6 = vpop.f32.mrf.mxu0  ;;  %v476_v7 = vpop.f32.mrf.mxu1 }
 0x13a   :  { %2941 = vst [vmem:[#allocation30_spill] sm:$0xff] %v2595_v44  ;;  %2942 = vst [vmem:[#allocation31_spill] sm:$0xff] %v2598_v35  ;;  %v2600_v0 = vadd.f32 %v403_v6, %v140_v22  ;;  %v2603_v10 = vadd.f32 %v476_v7, %v2543_v19  ;;  %v372_v44 = vadd.f32 %v2533_v12, %v136_v18 }
 0x13b   :  { %v405_v11 = vpop.f32.mrf.mxu0  ;;  %v478_v9 = vpop.f32.mrf.mxu1  ;;  %v374_v7 = vadd.f32 %v2539_v16, %v140_v22 }
 0x13c   :  { %2943 = vst [vmem:[#allocation32_spill] sm:$0xff] %v2600_v0  ;;  %2944 = vst [vmem:[#allocation33_spill] sm:$0xff] %v2603_v10  ;;  %v2605_v26 = vadd.f32 %v405_v11, %v136_v18  ;;  %v2608_v21 = vadd.f32 %v478_v9, %v2537_v14  ;;  %v447_v18 = vadd.f32 %v2541_v17, %v2543_v19 }
 0x13d   :  { %v407_v25 = vpop.f32.mrf.mxu0  ;;  %v480_v29 = vpop.f32.mrf.mxu1 }
 0x13e   :  { %2945 = vst [vmem:[#allocation34_spill] sm:$0xff] %v2605_v26  ;;  %2946 = vst [vmem:[#allocation35_spill] sm:$0xff] %v2608_v21  ;;  %v2611_v30 = vadd.f32 %v407_v25, %v140_v22  ;;  %v2614_v35 = vadd.f32 %v480_v29, %v2543_v19  ;;  %v445_v29 = vadd.f32 %v2535_v13, %v2537_v14 }
 0x13f   :  { %v748_v6 = vpop.f32.mrf.mxu0  ;;  %v789_v0 = vpop.f32.mrf.mxu1 }
 0x140   :  { %v796_v10 = vadd.f32 %v748_v6, %v372_v44  ;;  %v798_v44 = vadd.f32 %v789_v0, %v445_v29 }
 0x141   :  { %v750_v20 = vpop.f32.mrf.mxu0  ;;  %v791_v11 = vpop.f32.mrf.mxu1 }
 0x142   :  { %v1855_v26 = vmul.f32 -1.442695, %v796_v10  ;;  %v797_v15 = vadd.f32 %v750_v20, %v374_v7  ;;  %v799_v25 = vadd.f32 %v791_v11, %v447_v18 }
 0x143   :  { %v752_v9 = vpop.f32.mrf.mxu0  ;;  %v793_v21 = vpop.f32.mrf.mxu1 }
 0x144   :  { %2038 = vpow2.f32 %v1855_v26  ;;  %v1856_v8 = vmul.f32 -1.442695, %v797_v15  ;;  %v1857_v16 = vmul.f32 -1.442695, %v799_v25  ;;  %v2947_v9 = vmov 0  }
 0x145   :  { %v753_v32 = vpop.f32.mrf.mxu0  ;;  %v794_v12 = vpop.f32.mrf.mxu1 }
 0x146   :  { %2040 = vpow2.f32 %v1856_v8 }
 0x147   :  { %2042 = vpow2.f32 %v1857_v16 }
 0x151   :  { %v2039_v22 = vpop.eup %2038 }
 0x152   :  { %v803_v6 = vadd.f32 1.0, %v2039_v22 }
 0x153   :  { %v2041_v10 = vpop.eup %2040 }
 0x154   :  { %2044 = vrcp.f32 %v803_v6  ;;  %v809_v20 = vadd.f32 1.0, %v2041_v10  ;;  %v2043_v32 = vpop.eup %2042 }
 0x155   :  { %2046 = vtanh.f32 %v798_v44  ;;  %v816_v21 = vadd.f32 1.0, %v2043_v32 }
 0x156   :  { %2048 = vrcp.f32 %v809_v20 }
 0x157   :  { %2050 = vrcp.f32 %v816_v21 }
 0x161   :  { %v2045_v15 = vpop.eup %2044 }
 0x162   :  { %v2047_v8 = vpop.eup %2046 }
 0x163   :  { %v2049_v26 = vpop.eup %2048  ;;  %v820_v19 = vmul.f32 %v2047_v8, %v2045_v15 }
 0x164   :  { %v819_v17 = vmul.f32 0.0, %v2049_v26  ;;  %v2051_v0 = vpop.eup %2050 }
 0x166   :  { %v2621_v7 = vadd.f32 %v820_v19, %v819_v17 }
 0x168   :  { %2052 = vtanh.f32 %v2621_v7 }
 0x175   :  { %v2053_v13 = vpop.eup %2052 }
 0x176   :  { %v823_v14 = vmul.f32 %v2053_v13, %v2051_v0 }
 0x178   :  { %v831_v11 = vpack.c.bf16 %v823_v14, %v823_v14 }
 0x17a   :  { %865 = vmatmul.mubr.bf16.vlgmr.msra.gmra.mxu0 %v831_v11  ;;  %906 = vmatmul.mubr.bf16.vlgmr.msra.gmra.mxu1 %v831_v11 }
 0x17b   :  { %951 = vmatpush1.bf16.msra.mxu0 %v2395_v36  ;;  %992 = vmatpush1.bf16.msra.mxu1 %v2397_v37 }
 0x17c   :  { %952 = vmatprep.subr.bf16.mxu0 %v2401_v38  ;;  %993 = vmatprep.subr.bf16.mxu1 %v2403_v39 }
 0x17d   :  { %982 = vmatprep.mubr.bf16.mxu0 %v2947_v9  ;;  %1023 = vmatprep.mubr.bf16.mxu1 %v2947_v9 }
 0x17f   :  { %953 = vmatpush1.bf16.msra.mxu0 %v2405_v40  ;;  %994 = vmatpush1.bf16.msra.mxu1 %v2409_v41 }
 0x180   :  { %954 = vmatprep.subr.bf16.mxu0 %v2413_v42  ;;  %995 = vmatprep.subr.bf16.mxu1 %v2415_v43 }
 0x183   :  { %955 = vmatpush1.bf16.msra.mxu0 %v2419_v45  ;;  %996 = vmatpush1.bf16.msra.mxu1 %v2421_v46 }
 0x184   :  { %956 = vmatprep.subr.bf16.mxu0 %v2425_v47  ;;  %997 = vmatprep.subr.bf16.mxu1 %v2429_v48 }
 0x187   :  { %957 = vmatpush1.bf16.msra.mxu0 %v2431_v49  ;;  %998 = vmatpush1.bf16.msra.mxu1 %v2433_v50 }
 0x188   :  { %958 = vmatprep.subr.bf16.mxu0 %v2437_v51  ;;  %999 = vmatprep.subr.bf16.mxu1 %v2441_v52 }
 0x18b   :  { %959 = vmatpush1.bf16.msra.mxu0 %v2445_v54  ;;  %1000 = vmatpush1.bf16.msra.mxu1 %v2447_v55 }
 0x18c   :  { %960 = vmatprep.subr.bf16.mxu0 %v2449_v56  ;;  %1001 = vmatprep.subr.bf16.mxu1 %v2451_v57 }
 0x18f   :  { %961 = vmatpush1.bf16.msra.mxu0 %v2459_v58  ;;  %1002 = vmatpush1.bf16.msra.mxu1 %v2461_v59 }
 0x190   :  { %962 = vmatprep.subr.bf16.mxu0 %v2465_v60  ;;  %1003 = vmatprep.subr.bf16.mxu1 %v2467_v61 }
 0x193   :  { %963 = vmatpush1.bf16.msra.mxu0 %v2473_v63  ;;  %1004 = vmatpush1.bf16.msra.mxu1 %v2475_v1 }
 0x194   :  { %964 = vmatprep.subr.bf16.mxu0 %v2479_v2  ;;  %1005 = vmatprep.subr.bf16.mxu1 %v2481_v3 }
 0x197   :  { %965 = vmatpush1.bf16.msra.mxu0 %v2485_v4  ;;  %1006 = vmatpush1.bf16.msra.mxu1 %v2487_v5 }
 0x198   :  { %1068 = vmatprep.subr.bf16.mxu0 %v2391_v33  ;;  %1109 = vmatprep.subr.bf16.mxu1 %v2393_v34 }
 0x23a   :  { %v866_v12 = vpop.f32.mrf.mxu0  ;;  %v907_v18 = vpop.f32.mrf.mxu1 }
 0x23b   :  { %v914_v25 = vadd.f32 %v866_v12, %v2545_v23  ;;  %v916_v26 = vadd.f32 %v907_v18, %v2548_v24 }
 0x23c   :  { %v868_v29 = vpop.f32.mrf.mxu0  ;;  %v909_v16 = vpop.f32.mrf.mxu1 }
 0x23d   :  { %v1858_v22 = vmul.f32 -1.442695, %v914_v25  ;;  %v915_v44 = vadd.f32 %v868_v29, %v2550_v27  ;;  %v917_v8 = vadd.f32 %v909_v16, %v2553_v28 }
 0x23e   :  { %v870_v6 = vpop.f32.mrf.mxu0  ;;  %v911_v10 = vpop.f32.mrf.mxu1 }
 0x23f   :  { %2054 = vpow2.f32 %v1858_v22  ;;  %v1859_v20 = vmul.f32 -1.442695, %v915_v44  ;;  %v1860_v21 = vmul.f32 -1.442695, %v917_v8 }
 0x240   :  { %v871_v32 = vpop.f32.mrf.mxu0  ;;  %v912_v15 = vpop.f32.mrf.mxu1 }
 0x241   :  { %2056 = vpow2.f32 %v1859_v20 }
 0x242   :  { %2058 = vtanh.f32 %v916_v26 }
 0x243   :  { %2060 = vpow2.f32 %v1860_v21 }
 0x24c   :  { %v2055_v17 = vpop.eup %2054 }
 0x24d   :  { %v921_v19 = vadd.f32 1.0, %v2055_v17 }
 0x24e   :  { %v2057_v23 = vpop.eup %2056 }
 0x24f   :  { %2062 = vrcp.f32 %v921_v19  ;;  %v927_v0 = vadd.f32 1.0, %v2057_v23  ;;  %v2059_v27 = vpop.eup %2058 }
 0x250   :  { %v2061_v13 = vpop.eup %2060 }
 0x251   :  { %2064 = vrcp.f32 %v927_v0  ;;  %v934_v25 = vadd.f32 1.0, %v2061_v13  ;;  %v2948_v0 = vld [vmem:[#allocation17_spill] sm:$0xff] }
 0x253   :  { %2066 = vrcp.f32 %v934_v25 }
 0x25c   :  { %v2063_v14 = vpop.eup %2062 }
 0x25d   :  { %v938_v11 = vmul.f32 %v2063_v14, %v2059_v27 }
 0x25e   :  { %v2065_v12 = vpop.eup %2064 }
 0x25f   :  { %v937_v29 = vmul.f32 %v2065_v12, %v2621_v7 }
 0x260   :  { %v2067_v24 = vpop.eup %2066 }
 0x261   :  { %v2663_v28 = vadd.f32 %v938_v11, %v937_v29 }
 0x263   :  { %2068 = vtanh.f32 %v2663_v28 }
 0x270   :  { %v2069_v18 = vpop.eup %2068 }
 0x271   :  { %v941_v16 = vmul.f32 %v2069_v18, %v2067_v24 }
 0x273   :  { %v949_v22 = vpack.c.bf16 %v941_v16, %v941_v16 }
 0x275   :  { %983 = vmatmul.mubr.bf16.vlgmr.msra.gmra.mxu0 %v949_v22  ;;  %1024 = vmatmul.mubr.bf16.vlgmr.msra.gmra.mxu1 %v949_v22 }
 0x276   :  { %1069 = vmatpush1.bf16.msra.mxu0 %v2395_v36  ;;  %1110 = vmatpush1.bf16.msra.mxu1 %v2397_v37 }
 0x277   :  { %1070 = vmatprep.subr.bf16.mxu0 %v2401_v38  ;;  %1111 = vmatprep.subr.bf16.mxu1 %v2403_v39 }
 0x278   :  { %1100 = vmatprep.mubr.bf16.mxu0 %v2947_v9  ;;  %1141 = vmatprep.mubr.bf16.mxu1 %v2947_v9 }
 0x27a   :  { %1071 = vmatpush1.bf16.msra.mxu0 %v2405_v40  ;;  %1112 = vmatpush1.bf16.msra.mxu1 %v2409_v41 }
 0x27b   :  { %1072 = vmatprep.subr.bf16.mxu0 %v2413_v42  ;;  %1113 = vmatprep.subr.bf16.mxu1 %v2415_v43 }
 0x27e   :  { %1073 = vmatpush1.bf16.msra.mxu0 %v2419_v45  ;;  %1114 = vmatpush1.bf16.msra.mxu1 %v2421_v46 }
 0x27f   :  { %1074 = vmatprep.subr.bf16.mxu0 %v2425_v47  ;;  %1115 = vmatprep.subr.bf16.mxu1 %v2429_v48 }
 0x282   :  { %1075 = vmatpush1.bf16.msra.mxu0 %v2431_v49  ;;  %1116 = vmatpush1.bf16.msra.mxu1 %v2433_v50 }
 0x283   :  { %1076 = vmatprep.subr.bf16.mxu0 %v2437_v51  ;;  %1117 = vmatprep.subr.bf16.mxu1 %v2441_v52 }
 0x286   :  { %1077 = vmatpush1.bf16.msra.mxu0 %v2445_v54  ;;  %1118 = vmatpush1.bf16.msra.mxu1 %v2447_v55 }
 0x287   :  { %1078 = vmatprep.subr.bf16.mxu0 %v2449_v56  ;;  %1119 = vmatprep.subr.bf16.mxu1 %v2451_v57 }
 0x28a   :  { %1079 = vmatpush1.bf16.msra.mxu0 %v2459_v58  ;;  %1120 = vmatpush1.bf16.msra.mxu1 %v2461_v59 }
 0x28b   :  { %1080 = vmatprep.subr.bf16.mxu0 %v2465_v60  ;;  %1121 = vmatprep.subr.bf16.mxu1 %v2467_v61 }
 0x28e   :  { %1081 = vmatpush1.bf16.msra.mxu0 %v2473_v63  ;;  %1122 = vmatpush1.bf16.msra.mxu1 %v2475_v1 }
 0x28f   :  { %1082 = vmatprep.subr.bf16.mxu0 %v2479_v2  ;;  %1123 = vmatprep.subr.bf16.mxu1 %v2481_v3 }
 0x292   :  { %1083 = vmatpush1.bf16.msra.mxu0 %v2485_v4  ;;  %1124 = vmatpush1.bf16.msra.mxu1 %v2487_v5 }
 0x293   :  { %1186 = vmatprep.subr.bf16.mxu0 %v2391_v33  ;;  %1227 = vmatprep.subr.bf16.mxu1 %v2393_v34 }
 0x335   :  { %v984_v7 = vpop.f32.mrf.mxu0  ;;  %v1025_v44 = vpop.f32.mrf.mxu1 }
 0x336   :  { %v1032_v6 = vadd.f32 %v984_v7, %v2555_v31  ;;  %v1034_v27 = vadd.f32 %v1025_v44, %v2948_v0 }
 0x337   :  { %v986_v10 = vpop.f32.mrf.mxu0  ;;  %v1027_v20 = vpop.f32.mrf.mxu1 }
 0x338   :  { %v1861_v32 = vmul.f32 -1.442695, %v1032_v6  ;;  %v1033_v15 = vadd.f32 %v986_v10, %v2560_v53  ;;  %v1035_v23 = vadd.f32 %v1027_v20, %v2563_v62 }
 0x339   :  { %v988_v8 = vpop.f32.mrf.mxu0  ;;  %v1029_v26 = vpop.f32.mrf.mxu1 }
 0x33a   :  { %2070 = vpow2.f32 %v1861_v32  ;;  %v1862_v21 = vmul.f32 -1.442695, %v1033_v15  ;;  %v1863_v13 = vmul.f32 -1.442695, %v1035_v23  ;;  %v2949_v32 = vld [vmem:[#allocation18_spill] sm:$0xff] }
 0x33b   :  { %v989_v17 = vpop.f32.mrf.mxu0  ;;  %v1030_v19 = vpop.f32.mrf.mxu1 }
 0x33c   :  { %2072 = vpow2.f32 %v1862_v21  ;;  %v2950_v17 = vld [vmem:[#allocation20_spill] sm:$0xff] }
 0x33d   :  { %2074 = vtanh.f32 %v1034_v27 }
 0x33e   :  { %2076 = vpow2.f32 %v1863_v13 }
 0x347   :  { %v2071_v14 = vpop.eup %2070 }
 0x348   :  { %v1039_v11 = vadd.f32 1.0, %v2071_v14 }
 0x349   :  { %v2073_v31 = vpop.eup %2072 }
 0x34a   :  { %2078 = vrcp.f32 %v1039_v11  ;;  %v1045_v12 = vadd.f32 1.0, %v2073_v31  ;;  %v2075_v53 = vpop.eup %2074  ;;  %v2951_v11 = vld [vmem:[#allocation21_spill] sm:$0xff]  ;;  %v2952_v31 = vld [vmem:[#allocation19_spill] sm:$0xff] }
 0x34b   :  { %v2077_v25 = vpop.eup %2076 }
 0x34c   :  { %2080 = vrcp.f32 %v1045_v12  ;;  %v1052_v16 = vadd.f32 1.0, %v2077_v25 }
 0x34e   :  { %2082 = vrcp.f32 %v1052_v16 }
 0x357   :  { %v2079_v29 = vpop.eup %2078 }
 0x358   :  { %v1056_v24 = vmul.f32 %v2079_v29, %v2075_v53 }
 0x359   :  { %v2081_v18 = vpop.eup %2080 }
 0x35a   :  { %v1055_v22 = vmul.f32 %v2081_v18, %v2663_v28 }
 0x35b   :  { %v2083_v7 = vpop.eup %2082 }
 0x35c   :  { %v2705_v62 = vadd.f32 %v1056_v24, %v1055_v22 }
 0x35e   :  { %2084 = vtanh.f32 %v2705_v62 }
 0x36b   :  { %v2085_v44 = vpop.eup %2084 }
 0x36c   :  { %v1059_v6 = vmul.f32 %v2085_v44, %v2083_v7 }
 0x36e   :  { %v1067_v10 = vpack.c.bf16 %v1059_v6, %v1059_v6 }
 0x370   :  { %1101 = vmatmul.mubr.bf16.vlgmr.msra.gmra.mxu0 %v1067_v10  ;;  %1142 = vmatmul.mubr.bf16.vlgmr.msra.gmra.mxu1 %v1067_v10 }
 0x371   :  { %1187 = vmatpush1.bf16.msra.mxu0 %v2395_v36  ;;  %1228 = vmatpush1.bf16.msra.mxu1 %v2397_v37 }
 0x372   :  { %1188 = vmatprep.subr.bf16.mxu0 %v2401_v38  ;;  %1229 = vmatprep.subr.bf16.mxu1 %v2403_v39 }
 0x373   :  { %1218 = vmatprep.mubr.bf16.mxu0 %v2947_v9  ;;  %1259 = vmatprep.mubr.bf16.mxu1 %v2947_v9 }
 0x375   :  { %1189 = vmatpush1.bf16.msra.mxu0 %v2405_v40  ;;  %1230 = vmatpush1.bf16.msra.mxu1 %v2409_v41 }
 0x376   :  { %1190 = vmatprep.subr.bf16.mxu0 %v2413_v42  ;;  %1231 = vmatprep.subr.bf16.mxu1 %v2415_v43 }
 0x379   :  { %1191 = vmatpush1.bf16.msra.mxu0 %v2419_v45  ;;  %1232 = vmatpush1.bf16.msra.mxu1 %v2421_v46 }
 0x37a   :  { %1192 = vmatprep.subr.bf16.mxu0 %v2425_v47  ;;  %1233 = vmatprep.subr.bf16.mxu1 %v2429_v48 }
 0x37d   :  { %1193 = vmatpush1.bf16.msra.mxu0 %v2431_v49  ;;  %1234 = vmatpush1.bf16.msra.mxu1 %v2433_v50 }
 0x37e   :  { %1194 = vmatprep.subr.bf16.mxu0 %v2437_v51  ;;  %1235 = vmatprep.subr.bf16.mxu1 %v2441_v52 }
 0x381   :  { %1195 = vmatpush1.bf16.msra.mxu0 %v2445_v54  ;;  %1236 = vmatpush1.bf16.msra.mxu1 %v2447_v55 }
 0x382   :  { %1196 = vmatprep.subr.bf16.mxu0 %v2449_v56  ;;  %1237 = vmatprep.subr.bf16.mxu1 %v2451_v57 }
 0x385   :  { %1197 = vmatpush1.bf16.msra.mxu0 %v2459_v58  ;;  %1238 = vmatpush1.bf16.msra.mxu1 %v2461_v59 }
 0x386   :  { %1198 = vmatprep.subr.bf16.mxu0 %v2465_v60  ;;  %1239 = vmatprep.subr.bf16.mxu1 %v2467_v61 }
 0x389   :  { %1199 = vmatpush1.bf16.msra.mxu0 %v2473_v63  ;;  %1240 = vmatpush1.bf16.msra.mxu1 %v2475_v1 }
 0x38a   :  { %1200 = vmatprep.subr.bf16.mxu0 %v2479_v2  ;;  %1241 = vmatprep.subr.bf16.mxu1 %v2481_v3 }
 0x38d   :  { %1201 = vmatpush1.bf16.msra.mxu0 %v2485_v4  ;;  %1242 = vmatpush1.bf16.msra.mxu1 %v2487_v5 }
 0x38e   :  { %1304 = vmatprep.subr.bf16.mxu0 %v2391_v33  ;;  %1345 = vmatprep.subr.bf16.mxu1 %v2393_v34 }
 0x430   :  { %v1102_v28 = vpop.f32.mrf.mxu0  ;;  %v1143_v20 = vpop.f32.mrf.mxu1 }
 0x431   :  { %v1150_v15 = vadd.f32 %v1102_v28, %v2949_v32  ;;  %v1152_v34 = vadd.f32 %v1143_v20, %v2952_v31 }
 0x432   :  { %v1104_v8 = vpop.f32.mrf.mxu0  ;;  %v1145_v26 = vpop.f32.mrf.mxu1 }
 0x433   :  { %v1864_v21 = vmul.f32 -1.442695, %v1150_v15  ;;  %v1151_v19 = vadd.f32 %v1104_v8, %v2950_v17  ;;  %v1153_v33 = vadd.f32 %v1145_v26, %v2951_v11 }
 0x434   :  { %v1106_v23 = vpop.f32.mrf.mxu0  ;;  %v1147_v0 = vpop.f32.mrf.mxu1 }
 0x435   :  { %2086 = vpow2.f32 %v1864_v21  ;;  %v1865_v27 = vmul.f32 -1.442695, %v1151_v19  ;;  %v1866_v12 = vmul.f32 -1.442695, %v1153_v33 }
 0x436   :  { %v1107_v13 = vpop.f32.mrf.mxu0  ;;  %v1148_v14 = vpop.f32.mrf.mxu1 }
 0x437   :  { %2088 = vpow2.f32 %v1865_v27 }
 0x438   :  { %2090 = vtanh.f32 %v1152_v34 }
 0x439   :  { %2092 = vpow2.f32 %v1866_v12 }
 0x442   :  { %v2087_v53 = vpop.eup %2086 }
 0x443   :  { %v1157_v25 = vadd.f32 1.0, %v2087_v53 }
 0x444   :  { %v2089_v29 = vpop.eup %2088 }
 0x445   :  { %2094 = vrcp.f32 %v1157_v25  ;;  %v1163_v24 = vadd.f32 1.0, %v2089_v29  ;;  %v2091_v18 = vpop.eup %2090  ;;  %v2796_v29 = vld [vmem:[#allocation9 + $0xe0] ss:$16 sps:$4 sm:$0xff]  }
 0x446   :  { %v2093_v16 = vpop.eup %2092 }
 0x447   :  { %2096 = vrcp.f32 %v1163_v24  ;;  %v1170_v6 = vadd.f32 1.0, %v2093_v16  ;;  %v2799_v24 = vld [vmem:[#allocation9 + $0xe8] ss:$16 sps:$4 sm:$0xff]   ;;  %v2805_v16 = vld [vmem:[#allocation9 + $0xcc] ss:$16 sps:$4 sm:$0xff]  }
 0x449   :  { %2098 = vrcp.f32 %v1170_v6  ;;  %v2819_v6 = vld [vmem:[#allocation9 + $0xac] ss:$16 sps:$4 sm:$0xff]  }
 0x452   :  { %v2095_v22 = vpop.eup %2094 }
 0x453   :  { %v1174_v7 = vmul.f32 %v2095_v22, %v2091_v18  ;;  %v2802_v18 = vld [vmem:[#allocation9 + $0xc4] ss:$16 sps:$4 sm:$0xff]   ;;  %v2810_v22 = vld [vmem:[#allocation9 + $0xc0] ss:$16 sps:$4 sm:$0xff]  }
 0x454   :  { %v2097_v44 = vpop.eup %2096 }
 0x455   :  { %v1173_v10 = vmul.f32 %v2097_v44, %v2705_v62  ;;  %v2816_v44 = vld [vmem:[#allocation9 + $0xa4] ss:$16 sps:$4 sm:$0xff]  }
 0x456   :  { %v2099_v20 = vpop.eup %2098 }
 0x457   :  { %v2747_v28 = vadd.f32 %v1174_v7, %v1173_v10  ;;  %v2813_v7 = vld [vmem:[#allocation9 + $0xc8] ss:$16 sps:$4 sm:$0xff]   ;;  %v2822_v10 = vld [vmem:[#allocation9 + $0xa0] ss:$16 sps:$4 sm:$0xff]  }
 0x459   :  { %2100 = vtanh.f32 %v2747_v28 }
 0x466   :  { %v2101_v32 = vpop.eup %2100 }
 0x467   :  { %v1177_v15 = vmul.f32 %v2101_v32, %v2099_v20  ;;  %v2828_v20 = vld [vmem:[#allocation9 + $0x84] ss:$16 sps:$4 sm:$0xff]   ;;  %v2831_v32 = vld [vmem:[#allocation9 + $0x8c] ss:$16 sps:$4 sm:$0xff]  }
 0x469   :  { %v1185_v8 = vpack.c.bf16 %v1177_v15, %v1177_v15  ;;  %v2834_v15 = vld [vmem:[#allocation9 + $0x80] ss:$16 sps:$4 sm:$0xff]  }
 0x46b   :  { %1219 = vmatmul.mubr.bf16.vlgmr.msra.gmra.mxu0 %v1185_v8  ;;  %1260 = vmatmul.mubr.bf16.vlgmr.msra.gmra.mxu1 %v1185_v8  ;;  %v2837_v8 = vld [vmem:[#allocation9 + $0x88] ss:$16 sps:$4 sm:$0xff]  }
 0x46c   :  { %1305 = vmatpush1.bf16.msra.mxu0 %v2395_v36  ;;  %1346 = vmatpush1.bf16.msra.mxu1 %v2397_v37  ;;  %v2782_v36 = vld [vmem:[#allocation9 + $0xe4] ss:$16 sps:$4 sm:$0xff]   ;;  %v2785_v37 = vld [vmem:[#allocation9 + $0xec] ss:$16 sps:$4 sm:$0xff]  }
 0x46d   :  { %1306 = vmatprep.subr.bf16.mxu0 %v2401_v38  ;;  %1347 = vmatprep.subr.bf16.mxu1 %v2403_v39 }
 0x46e   :  { %1336 = vmatprep.mubr.bf16.mxu0 %v2947_v9  ;;  %1377 = vmatprep.mubr.bf16.mxu1 %v2947_v9 }
 0x470   :  { %1307 = vmatpush1.bf16.msra.mxu0 %v2405_v40  ;;  %1348 = vmatpush1.bf16.msra.mxu1 %v2409_v41  ;;  %v2953_v40 = vld [vmem:[#allocation22_spill] sm:$0xff] }
 0x471   :  { %1308 = vmatprep.subr.bf16.mxu0 %v2413_v42  ;;  %1349 = vmatprep.subr.bf16.mxu1 %v2415_v43 }
 0x474   :  { %1309 = vmatpush1.bf16.msra.mxu0 %v2419_v45  ;;  %1350 = vmatpush1.bf16.msra.mxu1 %v2421_v46  ;;  %v2954_v46 = vld [vmem:[#allocation24_spill] sm:$0xff] }
 0x475   :  { %1310 = vmatprep.subr.bf16.mxu0 %v2425_v47  ;;  %1351 = vmatprep.subr.bf16.mxu1 %v2429_v48 }
 0x478   :  { %1311 = vmatpush1.bf16.msra.mxu0 %v2431_v49  ;;  %1352 = vmatpush1.bf16.msra.mxu1 %v2433_v50 }
 0x479   :  { %1312 = vmatprep.subr.bf16.mxu0 %v2437_v51  ;;  %1353 = vmatprep.subr.bf16.mxu1 %v2441_v52 }
 0x47c   :  { %1313 = vmatpush1.bf16.msra.mxu0 %v2445_v54  ;;  %1354 = vmatpush1.bf16.msra.mxu1 %v2447_v55  ;;  %v2955_v54 = vld [vmem:[#allocation25_spill] sm:$0xff] }
 0x47d   :  { %1314 = vmatprep.subr.bf16.mxu0 %v2449_v56  ;;  %1355 = vmatprep.subr.bf16.mxu1 %v2451_v57  ;;  %v2956_v56 = vld [vmem:[#allocation23_spill] sm:$0xff] }
 0x480   :  { %1315 = vmatpush1.bf16.msra.mxu0 %v2459_v58  ;;  %1356 = vmatpush1.bf16.msra.mxu1 %v2461_v59 }
 0x481   :  { %1316 = vmatprep.subr.bf16.mxu0 %v2465_v60  ;;  %1357 = vmatprep.subr.bf16.mxu1 %v2467_v61 }
 0x484   :  { %1317 = vmatpush1.bf16.msra.mxu0 %v2473_v63  ;;  %1358 = vmatpush1.bf16.msra.mxu1 %v2475_v1 }
 0x485   :  { %1318 = vmatprep.subr.bf16.mxu0 %v2479_v2  ;;  %1359 = vmatprep.subr.bf16.mxu1 %v2481_v3 }
 0x488   :  { %1319 = vmatpush1.bf16.msra.mxu0 %v2485_v4  ;;  %1360 = vmatpush1.bf16.msra.mxu1 %v2487_v5 }
 0x489   :  { %1422 = vmatprep.subr.bf16.mxu0 %v2782_v36  ;;  %1463 = vmatprep.subr.bf16.mxu1 %v2785_v37 }
 0x52b   :  { %v1220_v38 = vpop.f32.mrf.mxu0  ;;  %v1261_v39 = vpop.f32.mrf.mxu1 }
 0x52c   :  { %v1268_v41 = vadd.f32 %v1220_v38, %v2953_v40  ;;  %v1270_v57 = vadd.f32 %v1261_v39, %v2956_v56  ;;  %v2840_v38 = vld [vmem:[#allocation9 + $0x64] ss:$16 sps:$4 sm:$0xff]   ;;  %v2843_v39 = vld [vmem:[#allocation9 + $0x6c] ss:$16 sps:$4 sm:$0xff]   ;;  %v2846_v40 = vld [vmem:[#allocation9 + $0x60] ss:$16 sps:$4 sm:$0xff]  }
 0x52d   :  { %v1222_v42 = vpop.f32.mrf.mxu0  ;;  %v1263_v43 = vpop.f32.mrf.mxu1 }
 0x52e   :  { %v1867_v45 = vmul.f32 -1.442695, %v1268_v41  ;;  %v1269_v47 = vadd.f32 %v1222_v42, %v2954_v46  ;;  %v1271_v55 = vadd.f32 %v1263_v43, %v2955_v54  ;;  %v2849_v41 = vld [vmem:[#allocation9 + $0x68] ss:$16 sps:$4 sm:$0xff]   ;;  %v2852_v42 = vld [vmem:[#allocation9 + $0x44] ss:$16 sps:$4 sm:$0xff]  }
 0x52f   :  { %v1224_v48 = vpop.f32.mrf.mxu0  ;;  %v1265_v49 = vpop.f32.mrf.mxu1  ;;  %v2855_v43 = vld [vmem:[#allocation9 + $0x4c] ss:$16 sps:$4 sm:$0xff]  }
 0x530   :  { %2102 = vpow2.f32 %v1867_v45  ;;  %v1868_v50 = vmul.f32 -1.442695, %v1269_v47  ;;  %v1869_v62 = vmul.f32 -1.442695, %v1271_v55 }
 0x531   :  { %v1225_v51 = vpop.f32.mrf.mxu0  ;;  %v1266_v52 = vpop.f32.mrf.mxu1 }
 0x532   :  { %2104 = vpow2.f32 %v1868_v50  ;;  %v2960_v50 = vld [vmem:[#allocation27_spill] sm:$0xff] }
 0x533   :  { %2106 = vtanh.f32 %v1270_v57 }
 0x534   :  { %2108 = vpow2.f32 %v1869_v62 }
 0x53d   :  { %v2103_v26 = vpop.eup %2102 }
 0x53e   :  { %v1275_v21 = vadd.f32 1.0, %v2103_v26 }
 0x53f   :  { %v2105_v17 = vpop.eup %2104 }
 0x540   :  { %2110 = vrcp.f32 %v1275_v21  ;;  %v1281_v19 = vadd.f32 1.0, %v2105_v17  ;;  %v2107_v23 = vpop.eup %2106 }
 0x541   :  { %v2109_v0 = vpop.eup %2108 }
 0x542   :  { %2112 = vrcp.f32 %v1281_v19  ;;  %v1288_v11 = vadd.f32 1.0, %v2109_v0 }
 0x544   :  { %2114 = vrcp.f32 %v1288_v11 }
 0x54d   :  { %v2111_v27 = vpop.eup %2110 }
 0x54e   :  { %v1292_v13 = vmul.f32 %v2111_v27, %v2107_v23 }
 0x54f   :  { %v2113_v14 = vpop.eup %2112 }
 0x550   :  { %v1291_v33 = vmul.f32 %v2113_v14, %v2747_v28  ;;  %v2825_v28 = vld [vmem:[#allocation9 + $0xa8] ss:$16 sps:$4 sm:$0xff]  }
 0x551   :  { %v2115_v34 = vpop.eup %2114 }
 0x552   :  { %v2793_v31 = vadd.f32 %v1292_v13, %v1291_v33  ;;  %v2189_v33 = vld [vmem:[#allocation9 + $0x48] ss:$16 sps:$4 sm:$0xff]  }
 0x554   :  { %2116 = vtanh.f32 %v2793_v31 }
 0x561   :  { %v2117_v12 = vpop.eup %2116 }
 0x562   :  { %v1295_v53 = vmul.f32 %v2117_v12, %v2115_v34  ;;  %v2191_v34 = vld [vmem:[#allocation9 + $0x2c] ss:$16 sps:$4 sm:$0xff]   ;;  %v2192_v12 = vld [vmem:[#allocation9 + $0x20] ss:$16 sps:$4 sm:$0xff]  }
 0x564   :  { %v1303_v25 = vpack.c.bf16 %v1295_v53, %v1295_v53  ;;  %v2193_v53 = vld [vmem:[#allocation9 + $0x28] ss:$16 sps:$4 sm:$0xff]  }
 0x566   :  { %1337 = vmatmul.mubr.bf16.vlgmr.msra.gmra.mxu0 %v1303_v25  ;;  %1378 = vmatmul.mubr.bf16.vlgmr.msra.gmra.mxu1 %v1303_v25  ;;  %v2194_v25 = vld [vmem:[#allocation9 + $0x4] ss:$16 sps:$4 sm:$0xff]  }
 0x567   :  { %1423 = vmatpush1.bf16.msra.mxu0 %v2796_v29  ;;  %1464 = vmatpush1.bf16.msra.mxu1 %v2799_v24 }
 0x568   :  { %1424 = vmatprep.subr.bf16.mxu0 %v2802_v18  ;;  %1465 = vmatprep.subr.bf16.mxu1 %v2805_v16 }
 0x569   :  { %1454 = vmatprep.mubr.bf16.mxu0 %v2947_v9  ;;  %1495 = vmatprep.mubr.bf16.mxu1 %v2947_v9 }
 0x56b   :  { %1425 = vmatpush1.bf16.msra.mxu0 %v2810_v22  ;;  %1466 = vmatpush1.bf16.msra.mxu1 %v2813_v7 }
 0x56c   :  { %1426 = vmatprep.subr.bf16.mxu0 %v2816_v44  ;;  %1467 = vmatprep.subr.bf16.mxu1 %v2819_v6 }
 0x56f   :  { %1427 = vmatpush1.bf16.msra.mxu0 %v2822_v10  ;;  %1468 = vmatpush1.bf16.msra.mxu1 %v2825_v28 }
 0x570   :  { %1428 = vmatprep.subr.bf16.mxu0 %v2828_v20  ;;  %1469 = vmatprep.subr.bf16.mxu1 %v2831_v32 }
 0x573   :  { %1429 = vmatpush1.bf16.msra.mxu0 %v2834_v15  ;;  %1470 = vmatpush1.bf16.msra.mxu1 %v2837_v8 }
 0x574   :  { %1430 = vmatprep.subr.bf16.mxu0 %v2840_v38  ;;  %1471 = vmatprep.subr.bf16.mxu1 %v2843_v39 }
 0x577   :  { %1431 = vmatpush1.bf16.msra.mxu0 %v2846_v40  ;;  %1472 = vmatpush1.bf16.msra.mxu1 %v2849_v41 }
 0x578   :  { %1432 = vmatprep.subr.bf16.mxu0 %v2852_v42  ;;  %1473 = vmatprep.subr.bf16.mxu1 %v2855_v43 }
 0x57b   :  { %1433 = vmatpush1.bf16.msra.mxu0 %v2459_v58  ;;  %1474 = vmatpush1.bf16.msra.mxu1 %v2461_v59 }
 0x57c   :  { %1434 = vmatprep.subr.bf16.mxu0 %v2465_v60  ;;  %1475 = vmatprep.subr.bf16.mxu1 %v2467_v61  ;;  %v2957_v60 = vld [vmem:[#allocation26_spill] sm:$0xff] }
 0x57f   :  { %1435 = vmatpush1.bf16.msra.mxu0 %v2473_v63  ;;  %1476 = vmatpush1.bf16.msra.mxu1 %v2475_v1  ;;  %v2958_v1 = vld [vmem:[#allocation28_spill] sm:$0xff] }
 0x580   :  { %1436 = vmatprep.subr.bf16.mxu0 %v2479_v2  ;;  %1477 = vmatprep.subr.bf16.mxu1 %v2481_v3 }
 0x583   :  { %1437 = vmatpush1.bf16.msra.mxu0 %v2485_v4  ;;  %1478 = vmatpush1.bf16.msra.mxu1 %v2487_v5  ;;  %v2959_v5 = vld [vmem:[#allocation29_spill] sm:$0xff] }
 0x584   :  { %1540 = vmatprep.subr.bf16.mxu0 %v2782_v36  ;;  %1581 = vmatprep.subr.bf16.mxu1 %v2785_v37 }
 0x626   :  { %v1338_v58 = vpop.f32.mrf.mxu0  ;;  %v1379_v59 = vpop.f32.mrf.mxu1 }
 0x627   :  { %v1386_v61 = vadd.f32 %v1338_v58, %v2957_v60  ;;  %v1388_v37 = vadd.f32 %v1379_v59, %v2960_v50 }
 0x628   :  { %v1340_v45 = vpop.f32.mrf.mxu0  ;;  %v1381_v63 = vpop.f32.mrf.mxu1 }
 0x629   :  { %v1870_v46 = vmul.f32 -1.442695, %v1386_v61  ;;  %v1387_v47 = vadd.f32 %v1340_v45, %v2958_v1  ;;  %v1389_v36 = vadd.f32 %v1381_v63, %v2959_v5 }
 0x62a   :  { %v1342_v2 = vpop.f32.mrf.mxu0  ;;  %v1383_v48 = vpop.f32.mrf.mxu1 }
 0x62b   :  { %2118 = vpow2.f32 %v1870_v46  ;;  %v1871_v3 = vmul.f32 -1.442695, %v1387_v47  ;;  %v1872_v51 = vmul.f32 -1.442695, %v1389_v36 }
 0x62c   :  { %v1343_v4 = vpop.f32.mrf.mxu0  ;;  %v1384_v49 = vpop.f32.mrf.mxu1 }
 0x62d   :  { %2120 = vpow2.f32 %v1871_v3 }
 0x62e   :  { %2122 = vtanh.f32 %v1388_v37 }
 0x62f   :  { %2124 = vpow2.f32 %v1872_v51  ;;  %v2030_v51 = vld [vmem:[#allocation11 + $0x38] sm:$0xff]  }
 0x638   :  { %v2119_v52 = vpop.eup %2118 }
 0x639   :  { %v1393_v54 = vadd.f32 1.0, %v2119_v52  ;;  %v2336_v52 = vmov 0.0  }
 0x63a   :  { %v2121_v55 = vpop.eup %2120 }
 0x63b   :  { %2126 = vrcp.f32 %v1393_v54  ;;  %v1399_v56 = vadd.f32 1.0, %v2121_v55  ;;  %v2123_v57 = vpop.eup %2122  ;;  %v2031_v54 = vld [vmem:[#allocation11 + $0x30] sm:$0xff]   ;;  %v2032_v55 = vld [vmem:[#allocation11 + $0x28] sm:$0xff]  }
 0x63c   :  { %v2125_v62 = vpop.eup %2124 }
 0x63d   :  { %2128 = vrcp.f32 %v1399_v56  ;;  %v1406_v19 = vadd.f32 1.0, %v2125_v62  ;;  %v2033_v56 = vld [vmem:[#allocation11 + $0x20] sm:$0xff]   ;;  %v2035_v62 = vld [vmem:[#allocation11 + $0x10] sm:$0xff]  }
 0x63f   :  { %2130 = vrcp.f32 %v1406_v19 }
 0x648   :  { %v2127_v26 = vpop.eup %2126 }
 0x649   :  { %v1410_v21 = vmul.f32 %v2127_v26, %v2123_v57  ;;  %v2034_v57 = vld [vmem:[#allocation11 + $0x18] sm:$0xff]   ;;  %v2036_v26 = vld [vmem:[#allocation11 + $0x8] sm:$0xff]  }
 0x64a   :  { %v2129_v17 = vpop.eup %2128 }
 0x64b   :  { %v1409_v23 = vmul.f32 %v2129_v17, %v2793_v31  ;;  %v2190_v31 = vld [vmem:[#allocation9 + $0x24] ss:$16 sps:$4 sm:$0xff]  }
 0x64c   :  { %v2131_v27 = vpop.eup %2130 }
 0x64d   :  { %v2875_v0 = vadd.f32 %v1410_v21, %v1409_v23  ;;  %v2037_v21 = vld [vmem:[#allocation11] sm:$0xff]   ;;  %v2965_v23 = vld [vmem:[#allocation34_spill] sm:$0xff] }
 0x64f   :  { %2132 = vtanh.f32 %v2875_v0 }
 0x65c   :  { %v2133_v13 = vpop.eup %2132 }
 0x65d   :  { %v1413_v14 = vmul.f32 %v2133_v13, %v2131_v27 }
 0x65f   :  { %v1421_v11 = vpack.c.bf16 %v1413_v14, %v1413_v14 }
 0x661   :  { %1455 = vmatmul.mubr.bf16.vlgmr.msra.gmra.mxu0 %v1421_v11  ;;  %1496 = vmatmul.mubr.bf16.vlgmr.msra.gmra.mxu1 %v1421_v11 }
 0x662   :  { %1541 = vmatpush1.bf16.msra.mxu0 %v2796_v29  ;;  %1582 = vmatpush1.bf16.msra.mxu1 %v2799_v24  ;;  %v2195_v29 = vld [vmem:[#allocation9 + $0xc] ss:$16 sps:$4 sm:$0xff]   ;;  %v2196_v24 = vld [vmem:[#allocation9] ss:$16 sps:$4 sm:$0xff]  }
 0x663   :  { %1542 = vmatprep.subr.bf16.mxu0 %v2802_v18  ;;  %1583 = vmatprep.subr.bf16.mxu1 %v2805_v16  ;;  %v2197_v18 = vld [vmem:[#allocation9 + $0x8] ss:$16 sps:$4 sm:$0xff]  }
 0x664   :  { %1572 = vmatprep.mubr.bf16.mxu0 %v2947_v9  ;;  %1613 = vmatprep.mubr.bf16.mxu1 %v2947_v9  ;;  %v2188_v9 = vld [vmem:[#allocation9 + $0x40] ss:$16 sps:$4 sm:$0xff]  }
 0x666   :  { %1543 = vmatpush1.bf16.msra.mxu0 %v2810_v22  ;;  %1584 = vmatpush1.bf16.msra.mxu1 %v2813_v7  ;;  %v2961_v7 = vld [vmem:[#allocation30_spill] sm:$0xff] }
 0x667   :  { %1544 = vmatprep.subr.bf16.mxu0 %v2816_v44  ;;  %1585 = vmatprep.subr.bf16.mxu1 %v2819_v6 }
 0x66a   :  { %1545 = vmatpush1.bf16.msra.mxu0 %v2822_v10  ;;  %1586 = vmatpush1.bf16.msra.mxu1 %v2825_v28 }
 0x66b   :  { %1546 = vmatprep.subr.bf16.mxu0 %v2828_v20  ;;  %1587 = vmatprep.subr.bf16.mxu1 %v2831_v32  ;;  %v2962_v20 = vld [vmem:[#allocation32_spill] sm:$0xff] }
 0x66e   :  { %1547 = vmatpush1.bf16.msra.mxu0 %v2834_v15  ;;  %1588 = vmatpush1.bf16.msra.mxu1 %v2837_v8 }
 0x66f   :  { %1548 = vmatprep.subr.bf16.mxu0 %v2840_v38  ;;  %1589 = vmatprep.subr.bf16.mxu1 %v2843_v39 }
 0x672   :  { %1549 = vmatpush1.bf16.msra.mxu0 %v2846_v40  ;;  %1590 = vmatpush1.bf16.msra.mxu1 %v2849_v41  ;;  %v2963_v41 = vld [vmem:[#allocation33_spill] sm:$0xff] }
 0x673   :  { %1550 = vmatprep.subr.bf16.mxu0 %v2852_v42  ;;  %1591 = vmatprep.subr.bf16.mxu1 %v2855_v43  ;;  %v2964_v43 = vld [vmem:[#allocation31_spill] sm:$0xff] }
 0x676   :  { %1551 = vmatpush1.bf16.msra.mxu0 %v2188_v9  ;;  %1592 = vmatpush1.bf16.msra.mxu1 %v2189_v33 }
 0x677   :  { %1552 = vmatprep.subr.bf16.mxu0 %v2190_v31  ;;  %1593 = vmatprep.subr.bf16.mxu1 %v2191_v34 }
 0x67a   :  { %1553 = vmatpush1.bf16.msra.mxu0 %v2192_v12  ;;  %1594 = vmatpush1.bf16.msra.mxu1 %v2193_v53 }
 0x67b   :  { %1554 = vmatprep.subr.bf16.mxu0 %v2194_v25  ;;  %1595 = vmatprep.subr.bf16.mxu1 %v2195_v29  ;;  %v2966_v25 = vld [vmem:[#allocation35_spill] sm:$0xff] }
 0x67e   :  { %1555 = vmatpush1.bf16.msra.mxu0 %v2196_v24  ;;  %1596 = vmatpush1.bf16.msra.mxu1 %v2197_v18 }
 0x67f   :  { %1897 = vmatprep.subr.bf16.mxu0 %v2336_v52 }
 0x721   :  { %v1456_v16 = vpop.f32.mrf.mxu0  ;;  %v1497_v22 = vpop.f32.mrf.mxu1 }
 0x722   :  { %v1504_v44 = vadd.f32 %v1456_v16, %v2961_v7  ;;  %v1506_v58 = vadd.f32 %v1497_v22, %v2964_v43 }
 0x723   :  { %v1458_v6 = vpop.f32.mrf.mxu0  ;;  %v1499_v10 = vpop.f32.mrf.mxu1 }
 0x724   :  { %v1873_v28 = vmul.f32 -1.442695, %v1504_v44  ;;  %v1505_v32 = vadd.f32 %v1458_v6, %v2962_v20  ;;  %v1507_v42 = vadd.f32 %v1499_v10, %v2963_v41 }
 0x725   :  { %v1460_v15 = vpop.f32.mrf.mxu0  ;;  %v1501_v8 = vpop.f32.mrf.mxu1 }
 0x726   :  { %2134 = vpow2.f32 %v1873_v28  ;;  %v1874_v38 = vmul.f32 -1.442695, %v1505_v32  ;;  %v1875_v59 = vmul.f32 -1.442695, %v1507_v42 }
 0x727   :  { %v1461_v39 = vpop.f32.mrf.mxu0  ;;  %v1502_v40 = vpop.f32.mrf.mxu1 }
 0x728   :  { %2136 = vpow2.f32 %v1874_v38  ;;  %v1879_v40 = vld [vmem:[%s2924_s5] ss:$0 sm:$0xff] }
 0x729   :  { %2138 = vtanh.f32 %v1506_v58 }
 0x72a   :  { %2140 = vpow2.f32 %v1875_v59 }
 0x733   :  { %v2135_v60 = vpop.eup %2134 }
 0x734   :  { %v1511_v61 = vadd.f32 1.0, %v2135_v60 }
 0x735   :  { %v2137_v45 = vpop.eup %2136 }
 0x736   :  { %2142 = vrcp.f32 %v1511_v61  ;;  %v1517_v63 = vadd.f32 1.0, %v2137_v45  ;;  %v2139_v46 = vpop.eup %2138 }
 0x737   :  { %v2141_v1 = vpop.eup %2140 }
 0x738   :  { %2144 = vrcp.f32 %v1517_v63  ;;  %v1524_v3 = vadd.f32 1.0, %v2141_v1 }
 0x73a   :  { %2146 = vrcp.f32 %v1524_v3 }
 0x743   :  { %v2143_v47 = vpop.eup %2142 }
 0x744   :  { %v1528_v2 = vmul.f32 %v2143_v47, %v2139_v46 }
 0x745   :  { %v2145_v48 = vpop.eup %2144 }
 0x746   :  { %v1527_v4 = vmul.f32 %v2145_v48, %v2875_v0 }
 0x747   :  { %v2147_v5 = vpop.eup %2146 }
 0x748   :  { %v2905_v49 = vadd.f32 %v1528_v2, %v1527_v4 }
 0x74a   :  { %2148 = vtanh.f32 %v2905_v49 }
 0x757   :  { %v2149_v36 = vpop.eup %2148 }
 0x758   :  { %v1531_v50 = vmul.f32 %v2149_v36, %v2147_v5 }
 0x75a   :  { %v1539_v37 = vpack.c.bf16 %v1531_v50, %v1531_v50 }
 0x75c   :  { %1573 = vmatmul.mubr.bf16.vlgmr.msra.gmra.mxu0 %v1539_v37  ;;  %1614 = vmatmul.mubr.bf16.vlgmr.msra.gmra.mxu1 %v1539_v37 }
 0x75d   :  { %1898 = vmatpush3.bf16.msra.mxu0 %v2030_v51  ;;  %1913 = vmatprep.mubr.msk.bf16.mxu0 %vm2337_vm0, %v2336_v52 }
 0x75e   :  { %1899 = vmatprep.subr.bf16.mxu0 %v2336_v52 }
 0x761   :  { %1900 = vmatpush3.bf16.msra.mxu0 %v2031_v54 }
 0x762   :  { %1901 = vmatprep.subr.bf16.mxu0 %v2336_v52 }
 0x765   :  { %1902 = vmatpush3.bf16.msra.mxu0 %v2032_v55 }
 0x766   :  { %1903 = vmatprep.subr.bf16.mxu0 %v2336_v52 }
 0x769   :  { %1904 = vmatpush3.bf16.msra.mxu0 %v2033_v56 }
 0x76a   :  { %1905 = vmatprep.subr.bf16.mxu0 %v2336_v52 }
 0x76d   :  { %1906 = vmatpush3.bf16.msra.mxu0 %v2034_v57 }
 0x76e   :  { %1907 = vmatprep.subr.bf16.mxu0 %v2336_v52 }
 0x771   :  { %1908 = vmatpush3.bf16.msra.mxu0 %v2035_v62 }
 0x772   :  { %1909 = vmatprep.subr.bf16.mxu0 %v2336_v52 }
 0x775   :  { %1910 = vmatpush3.bf16.msra.mxu0 %v2036_v26 }
 0x776   :  { %1911 = vmatprep.subr.bf16.mxu0 %v2336_v52 }
 0x779   :  { %1912 = vmatpush3.bf16.msra.mxu0 %v2037_v21 }
 0x81c   :  { %v1574_v17 = vpop.f32.mrf.mxu0  ;;  %v1615_v19 = vpop.f32.mrf.mxu1 }
 0x81d   :  { %v1622_v0 = vadd.f32 %v1574_v17, %v2965_v23  ;;  %v1624_v29 = vadd.f32 %v1615_v19, %v2966_v25 }
 0x81e   :  { %v1576_v27 = vpop.f32.mrf.mxu0  ;;  %v1617_v13 = vpop.f32.mrf.mxu1 }
 0x81f   :  { %v1876_v14 = vmul.f32 -1.442695, %v1622_v0  ;;  %v1623_v11 = vadd.f32 %v1576_v27, %v2611_v30  ;;  %v1625_v53 = vadd.f32 %v1617_v13, %v2614_v35 }
 0x820   :  { %v1578_v9 = vpop.f32.mrf.mxu0  ;;  %v1619_v33 = vpop.f32.mrf.mxu1 }
 0x821   :  { %2150 = vpow2.f32 %v1876_v14  ;;  %v1877_v31 = vmul.f32 -1.442695, %v1623_v11  ;;  %v1878_v24 = vmul.f32 -1.442695, %v1625_v53 }
 0x822   :  { %v1579_v34 = vpop.f32.mrf.mxu0  ;;  %v1620_v12 = vpop.f32.mrf.mxu1 }
 0x823   :  { %2152 = vpow2.f32 %v1877_v31 }
 0x824   :  { %2154 = vtanh.f32 %v1624_v29 }
 0x825   :  { %2156 = vpow2.f32 %v1878_v24 }
 0x82e   :  { %v2151_v18 = vpop.eup %2150 }
 0x82f   :  { %v1629_v16 = vadd.f32 1.0, %v2151_v18 }
 0x830   :  { %v2153_v22 = vpop.eup %2152 }
 0x831   :  { %2158 = vrcp.f32 %v1629_v16  ;;  %v1635_v7 = vadd.f32 1.0, %v2153_v22  ;;  %v2155_v30 = vpop.eup %2154 }
 0x832   :  { %v2157_v44 = vpop.eup %2156 }
 0x833   :  { %2160 = vrcp.f32 %v1635_v7  ;;  %v1642_v20 = vadd.f32 1.0, %v2157_v44 }
 0x835   :  { %2162 = vrcp.f32 %v1642_v20 }
 0x83e   :  { %v2159_v6 = vpop.eup %2158 }
 0x83f   :  { %v1646_v10 = vmul.f32 %v2159_v6, %v2155_v30 }
 0x840   :  { %v2161_v28 = vpop.eup %2160 }
 0x841   :  { %v1645_v32 = vmul.f32 %v2161_v28, %v2905_v49 }
 0x842   :  { %v2163_v15 = vpop.eup %2162 }
 0x843   :  { %v1647_v35 = vadd.f32 %v1646_v10, %v1645_v32 }
 0x845   :  { %2164 = vtanh.f32 %v1647_v35 }
 0x852   :  { %v2165_v8 = vpop.eup %2164 }
 0x853   :  { %v1649_v38 = vmul.f32 %v2165_v8, %v2163_v15 }
 0x855   :  { %v1650_v39 = vpack.c.bf16 %v1649_v38, %v1649_v38 }
 0x857   :  { %1914 = vmatmul.mubr.bf16.vlgmr.msra.gmra.mxu0 %v1650_v39 }
 0x917   :  { %v1756_v41 = vpop.f32.mrf.mxu0 }
 0x918   :  { %v1757_v42 = vadd.f32 %v1879_v40, %v1756_v41 }
 0x919   :  { %v1915_v43 = vpop.f32.mrf.mxu0 }
 0x91a   :  { %1762 = vst [vmem:[#allocation12] sm:$0xff] %v1757_v42 }
 0x91b   :  { %v1759_v58 = vpop.f32.mrf.mxu0 }
 0x91c   :  { %2309 = shalt.err (!%p2306_p1)
}
 0x91d   :  { %1772 = dma.vmem_to_hbm [thread:$0]  %s1770_s24, 128, %s2925_s6, [#allocation5]   ;;  %v1916_v59 = vpop.f32.mrf.mxu0 }
 0x91e   :  { %2324 = dma.done.wait [#allocation5], 128  }
 0x91f   :  { %2325 = vsyncadd [#allocation5], 4294967168 }
 0x920   :  { %1776 = vsyncpa [#allocation4], 1 }
 0x921   :  { %1777 = vsyncpa [#allocation7], 1 }
 0x922   :  { %1778 = vsyncpa [#allocation10], 1 }
 0x923   :  { %1779 = vsyncpa [#allocation5], 1 }

</bundles_post_ra>
